<compile_context>
chip_gen: v6e
topology: v6e:2x2x1
jax: 0.10.0
libtpu: 0.0.40
codegen_flags: <defaults>
</compile_context>

<pallas_src>
import jax
import jax.numpy as jnp
from jax.experimental import pallas as pl
from jax.experimental.pallas import tpu as pltpu

TILE_B = 256  # batch rows per grid step (sweep 256-2048; multiple of 256 fills MXU M)


def hybrid_qnn_kernel(x_ref, w1_ref, b1_ref, w2_ref, b2_ref, w3_ref, b3_ref,
                      w4_ref, b4_ref, w5t_ref, b5_ref, o_ref):
    x = x_ref[...]                                                   # (TILE_B, 1) f32

    # fc1: in_features == 1 -> broadcast multiply (avoids a K=1 MXU matmul)
    h = jnp.maximum(x * w1_ref[...] + b1_ref[...], 0.0)             # (TILE_B, 256)

    # fc2
    h = jnp.maximum(
        jnp.dot(h, w2_ref[...], preferred_element_type=jnp.float32) + b2_ref[...],
        0.0)                                                         # (TILE_B, 128)

    # dropout(p=0.25): identity in eval/inference mode

    # fc3
    h = jnp.maximum(
        jnp.dot(h, w3_ref[...], preferred_element_type=jnp.float32) + b3_ref[...],
        0.0)                                                         # (TILE_B, 64)

    # fc4
    h = jnp.maximum(
        jnp.dot(h, w4_ref[...], preferred_element_type=jnp.float32) + b4_ref[...],
        0.0)                                                         # (TILE_B, 32)

    # fc5 computed transposed: (2, 32) @ (32, TILE_B) -> (2, TILE_B), so the tail
    # (cos / exp / divide) and the output store are lane-dense (128-wide lanes).
    th = jnp.maximum(
        jnp.dot(w5t_ref[...], h.T, preferred_element_type=jnp.float32) + b5_ref[...],
        0.0)                                                         # (2, TILE_B)

    theta0 = th[0:1, :]                                              # (1, TILE_B)
    theta1 = th[1:2, :]                                              # (1, TILE_B)

    # QuantumLayer: single qubit, ry(theta0) then rx(theta1) on |0>, measure <Z>.
    # Analytic expectation: <Z> = cos(theta0) * cos(theta1).
    exp_z = jnp.cos(theta0) * jnp.cos(theta1)                        # (1, TILE_B)

    # sigmoid, lane-dense store
    o_ref[...] = 1.0 / (1.0 + jnp.exp(-exp_z))


def _full_spec(shape):
    nd = len(shape)
    return pl.BlockSpec(shape, lambda i, _nd=nd: (0,) * _nd)


@jax.jit
def hybrid_qnn_forward(x, w1, b1, w2, b2, w3, b3, w4, b4, w5t, b5):
    B = x.shape[0]
    num_tiles = pl.cdiv(B, TILE_B)
    b_pad = num_tiles * TILE_B
    # Zero-pad ragged batches to the tile; padded rows produce finite garbage that is
    # simply dropped after the final slice.
    x_pad = jnp.pad(x, ((0, b_pad - B), (0, 0)))

    out = pl.pallas_call(
        hybrid_qnn_kernel,
        out_shape=jax.ShapeDtypeStruct((1, b_pad), jnp.float32),
        grid_spec=pltpu.PrefetchScalarGridSpec(
            num_scalar_prefetch=0,
            grid=(num_tiles,),
            in_specs=[
                pl.BlockSpec((TILE_B, 1), lambda i: (i, 0)),   # x batch tile
                _full_spec(w1.shape), _full_spec(b1.shape),    # constant index maps:
                _full_spec(w2.shape), _full_spec(b2.shape),    # weights DMA'd once and
                _full_spec(w3.shape), _full_spec(b3.shape),    # kept resident in VMEM
                _full_spec(w4.shape), _full_spec(b4.shape),
                _full_spec(w5t.shape), _full_spec(b5.shape),
            ],
            # Lane-dense output: (1, TILE_B) block, last dim multiple of 128.
            out_specs=pl.BlockSpec((1, TILE_B), lambda i: (0, i)),
        ),
        compiler_params=pltpu.CompilerParams(
            dimension_semantics=("parallel",)),   # independent batch tiles (v7x: 2 TCs)
    )(x_pad, w1, b1, w2, b2, w3, b3, w4, b4, w5t, b5)
    return out.reshape(-1)[:B]  # matches x.view(-1)


def init_params(key):
    """Deterministic PyTorch-style init: U(-1/sqrt(fan_in), 1/sqrt(fan_in)).
    fc1..fc4 weights stored as (in, out), biases as (1, out).
    fc5 stored transposed as (out=2, in=32) with bias (2, 1) for the lane-dense tail."""
    dims = [(1, 256), (256, 128), (128, 64), (64, 32), (32, 2)]
    params = []
    keys = jax.random.split(key, 2 * len(dims))
    for idx, (fan_in, fan_out) in enumerate(dims):
        bound = 1.0 / jnp.sqrt(jnp.float32(fan_in))
        w = jax.random.uniform(keys[2 * idx], (fan_in, fan_out),
                               minval=-bound, maxval=bound, dtype=jnp.float32)
        b = jax.random.uniform(keys[2 * idx + 1], (1, fan_out),
                               minval=-bound, maxval=bound, dtype=jnp.float32)
        params.append((w, b))
    (w1, b1), (w2, b2), (w3, b3), (w4, b4), (w5, b5) = params
    w5t = w5.T          # (2, 32)
    b5c = b5.T          # (2, 1)
    return w1, b1, w2, b2, w3, b3, w4, b4, w5t, b5c


def reference_forward(x, w1, b1, w2, b2, w3, b3, w4, b4, w5t, b5):
    """Pure-JAX reference of the same forward pass (for a sanity check)."""
    h = jnp.maximum(x @ w1 + b1, 0.0)
    h = jnp.maximum(h @ w2 + b2, 0.0)
    h = jnp.maximum(h @ w3 + b3, 0.0)
    h = jnp.maximum(h @ w4 + b4, 0.0)
    h5 = jnp.maximum(h @ w5t.T + b5.T, 0.0)                 # (B, 2)
    exp_z = jnp.cos(h5[:, 0:1]) * jnp.cos(h5[:, 1:2])
    return jax.nn.sigmoid(exp_z).reshape(-1)


if __name__ == "__main__":
    key = jax.random.PRNGKey(0)
    pkey, xkey = jax.random.split(key)
    params = init_params(pkey)

    # Ragged vs TILE_B=256: exercises zero-padding and a 2-step parallel grid.
    B = 300
    x = jax.random.normal(xkey, (B, 1), dtype=jnp.float32)

    out = jax.block_until_ready(hybrid_qnn_forward(x, *params))
    ref = reference_forward(x, *params)

    assert out.shape == (B,)
    assert bool(jnp.all(jnp.isfinite(out)))
    assert bool(jnp.allclose(out, ref, rtol=2e-4, atol=2e-4)), "mismatch vs JAX reference"

    print("KERNEL_OK")
</pallas_src>

<mosaic_0001>
module attributes {stable_mosaic.version = 11 : i64} {
  func.func @hybrid_qnn_kernel(%arg0: i32, %arg1: memref<256x1xf32, #tpu.memory_space<vmem>>, %arg2: memref<1x256xf32, #tpu.memory_space<vmem>>, %arg3: memref<1x256xf32, #tpu.memory_space<vmem>>, %arg4: memref<256x128xf32, #tpu.memory_space<vmem>>, %arg5: memref<1x128xf32, #tpu.memory_space<vmem>>, %arg6: memref<128x64xf32, #tpu.memory_space<vmem>>, %arg7: memref<1x64xf32, #tpu.memory_space<vmem>>, %arg8: memref<64x32xf32, #tpu.memory_space<vmem>>, %arg9: memref<1x32xf32, #tpu.memory_space<vmem>>, %arg10: memref<2x32xf32, #tpu.memory_space<vmem>>, %arg11: memref<2x1xf32, #tpu.memory_space<vmem>>, %arg12: memref<1x256xf32, #tpu.memory_space<vmem>>) attributes {dimension_semantics = [#tpu.dimension_semantics<parallel>], iteration_bounds = array<i64: 2>, scalar_prefetch = 0 : i64, scratch_operands = 0 : i64, tpu.core_type = #tpu.core_type<tc>, window_params = [{transform_indices = @transform_0, window_bounds = array<i64: 256, 1>}, {pipeline_mode = #tpu.pipeline_mode<synchronous>, transform_indices = @transform_1, window_bounds = array<i64: 1, 256>}, {pipeline_mode = #tpu.pipeline_mode<synchronous>, transform_indices = @transform_2, window_bounds = array<i64: 1, 256>}, {pipeline_mode = #tpu.pipeline_mode<synchronous>, transform_indices = @transform_3, window_bounds = array<i64: 256, 128>}, {pipeline_mode = #tpu.pipeline_mode<synchronous>, transform_indices = @transform_4, window_bounds = array<i64: 1, 128>}, {pipeline_mode = #tpu.pipeline_mode<synchronous>, transform_indices = @transform_5, window_bounds = array<i64: 128, 64>}, {pipeline_mode = #tpu.pipeline_mode<synchronous>, transform_indices = @transform_6, window_bounds = array<i64: 1, 64>}, {pipeline_mode = #tpu.pipeline_mode<synchronous>, transform_indices = @transform_7, window_bounds = array<i64: 64, 32>}, {pipeline_mode = #tpu.pipeline_mode<synchronous>, transform_indices = @transform_8, window_bounds = array<i64: 1, 32>}, {pipeline_mode = #tpu.pipeline_mode<synchronous>, transform_indices = @transform_9, window_bounds = array<i64: 2, 32>}, {pipeline_mode = #tpu.pipeline_mode<synchronous>, transform_indices = @transform_10, window_bounds = array<i64: 2, 1>}, {transform_indices = @transform_11, window_bounds = array<i64: 1, 256>}]} {
    %c0 = arith.constant 0 : index
    %c0_0 = arith.constant 0 : index
    %0 = vector.load %arg1[%c0, %c0_0] : memref<256x1xf32, #tpu.memory_space<vmem>>, vector<256x1xf32>
    %c0_1 = arith.constant 0 : index
    %c0_2 = arith.constant 0 : index
    %1 = vector.load %arg2[%c0_1, %c0_2] : memref<1x256xf32, #tpu.memory_space<vmem>>, vector<1x256xf32>
    %2 = vector.broadcast %0 : vector<256x1xf32> to vector<256x256xf32>
    %3 = vector.broadcast %1 : vector<1x256xf32> to vector<256x256xf32>
    %4 = arith.mulf %2, %3 : vector<256x256xf32>
    %c0_3 = arith.constant 0 : index
    %c0_4 = arith.constant 0 : index
    %5 = vector.load %arg3[%c0_3, %c0_4] : memref<1x256xf32, #tpu.memory_space<vmem>>, vector<1x256xf32>
    %6 = vector.broadcast %5 : vector<1x256xf32> to vector<256x256xf32>
    %7 = arith.addf %4, %6 : vector<256x256xf32>
    %cst = arith.constant 0.000000e+00 : f32
    %8 = vector.broadcast %cst : f32 to vector<256x256xf32>
    %9 = arith.maximumf %7, %8 : vector<256x256xf32>
    %c0_5 = arith.constant 0 : index
    %c0_6 = arith.constant 0 : index
    %10 = vector.load %arg4[%c0_5, %c0_6] : memref<256x128xf32, #tpu.memory_space<vmem>>, vector<256x128xf32>
    %cst_7 = arith.constant dense<0.000000e+00> : vector<256x128xf32>
    %11 = tpu.matmul %9, %10, %cst_7 {dimension_numbers = #tpu.dot_dimension_numbers<[1], [0], [0], [1], [0, 0, 1, 1], [], []>} : vector<256x256xf32>, vector<256x128xf32>, vector<256x128xf32> -> vector<256x128xf32>
    %c0_8 = arith.constant 0 : index
    %c0_9 = arith.constant 0 : index
    %12 = vector.load %arg5[%c0_8, %c0_9] : memref<1x128xf32, #tpu.memory_space<vmem>>, vector<1x128xf32>
    %13 = vector.broadcast %12 : vector<1x128xf32> to vector<256x128xf32>
    %14 = arith.addf %11, %13 : vector<256x128xf32>
    %cst_10 = arith.constant 0.000000e+00 : f32
    %15 = vector.broadcast %cst_10 : f32 to vector<256x128xf32>
    %16 = arith.maximumf %14, %15 : vector<256x128xf32>
    %c0_11 = arith.constant 0 : index
    %c0_12 = arith.constant 0 : index
    %17 = vector.load %arg6[%c0_11, %c0_12] : memref<128x64xf32, #tpu.memory_space<vmem>>, vector<128x64xf32>
    %cst_13 = arith.constant dense<0.000000e+00> : vector<256x64xf32>
    %18 = tpu.matmul %16, %17, %cst_13 {dimension_numbers = #tpu.dot_dimension_numbers<[1], [0], [0], [1], [0, 0, 1, 1], [], []>} : vector<256x128xf32>, vector<128x64xf32>, vector<256x64xf32> -> vector<256x64xf32>
    %c0_14 = arith.constant 0 : index
    %c0_15 = arith.constant 0 : index
    %19 = vector.load %arg7[%c0_14, %c0_15] : memref<1x64xf32, #tpu.memory_space<vmem>>, vector<1x64xf32>
    %20 = vector.broadcast %19 : vector<1x64xf32> to vector<256x64xf32>
    %21 = arith.addf %18, %20 : vector<256x64xf32>
    %cst_16 = arith.constant 0.000000e+00 : f32
    %22 = vector.broadcast %cst_16 : f32 to vector<256x64xf32>
    %23 = arith.maximumf %21, %22 : vector<256x64xf32>
    %c0_17 = arith.constant 0 : index
    %c0_18 = arith.constant 0 : index
    %24 = vector.load %arg8[%c0_17, %c0_18] : memref<64x32xf32, #tpu.memory_space<vmem>>, vector<64x32xf32>
    %cst_19 = arith.constant dense<0.000000e+00> : vector<256x32xf32>
    %25 = tpu.matmul %23, %24, %cst_19 {dimension_numbers = #tpu.dot_dimension_numbers<[1], [0], [0], [1], [0, 0, 1, 1], [], []>} : vector<256x64xf32>, vector<64x32xf32>, vector<256x32xf32> -> vector<256x32xf32>
    %c0_20 = arith.constant 0 : index
    %c0_21 = arith.constant 0 : index
    %26 = vector.load %arg9[%c0_20, %c0_21] : memref<1x32xf32, #tpu.memory_space<vmem>>, vector<1x32xf32>
    %27 = vector.broadcast %26 : vector<1x32xf32> to vector<256x32xf32>
    %28 = arith.addf %25, %27 : vector<256x32xf32>
    %cst_22 = arith.constant 0.000000e+00 : f32
    %29 = vector.broadcast %cst_22 : f32 to vector<256x32xf32>
    %30 = arith.maximumf %28, %29 : vector<256x32xf32>
    %c0_23 = arith.constant 0 : index
    %c0_24 = arith.constant 0 : index
    %31 = vector.load %arg10[%c0_23, %c0_24] : memref<2x32xf32, #tpu.memory_space<vmem>>, vector<2x32xf32>
    %32 = tpu.transpose %30, [1, 0] : vector<256x32xf32> -> vector<32x256xf32>
    %cst_25 = arith.constant dense<0.000000e+00> : vector<2x256xf32>
    %33 = tpu.matmul %31, %32, %cst_25 {dimension_numbers = #tpu.dot_dimension_numbers<[1], [0], [0], [1], [0, 0, 1, 1], [], []>} : vector<2x32xf32>, vector<32x256xf32>, vector<2x256xf32> -> vector<2x256xf32>
    %c0_26 = arith.constant 0 : index
    %c0_27 = arith.constant 0 : index
    %34 = vector.load %arg11[%c0_26, %c0_27] : memref<2x1xf32, #tpu.memory_space<vmem>>, vector<2x1xf32>
    %35 = vector.broadcast %34 : vector<2x1xf32> to vector<2x256xf32>
    %36 = arith.addf %33, %35 : vector<2x256xf32>
    %cst_28 = arith.constant 0.000000e+00 : f32
    %37 = vector.broadcast %cst_28 : f32 to vector<2x256xf32>
    %38 = arith.maximumf %36, %37 : vector<2x256xf32>
    %39 = vector.extract_strided_slice %38 {offsets = [0, 0], sizes = [1, 256], strides = [1, 1]} : vector<2x256xf32> to vector<1x256xf32>
    %40 = vector.extract_strided_slice %38 {offsets = [1, 0], sizes = [1, 256], strides = [1, 1]} : vector<2x256xf32> to vector<1x256xf32>
    %41 = math.cos %39 : vector<1x256xf32>
    %42 = math.cos %40 : vector<1x256xf32>
    %43 = arith.mulf %41, %42 : vector<1x256xf32>
    %cst_29 = arith.constant 0.000000e+00 : f32
    %44 = vector.broadcast %cst_29 : f32 to vector<1x256xf32>
    %45 = arith.subf %44, %43 : vector<1x256xf32>
    %46 = math.exp %45 : vector<1x256xf32>
    %cst_30 = arith.constant 1.000000e+00 : f32
    %47 = vector.broadcast %cst_30 : f32 to vector<1x256xf32>
    %48 = arith.addf %47, %46 : vector<1x256xf32>
    %cst_31 = arith.constant 1.000000e+00 : f32
    %49 = vector.broadcast %cst_31 : f32 to vector<1x256xf32>
    %50 = arith.divf %49, %48 : vector<1x256xf32>
    %c0_32 = arith.constant 0 : index
    %c0_33 = arith.constant 0 : index
    %51 = vector.load %arg12[%c0_32, %c0_33] : memref<1x256xf32, #tpu.memory_space<vmem>>, vector<1x256xf32>
    tpu.vector_store %arg12[%c0_32, %c0_33], %50 {strides = array<i32>} : memref<1x256xf32, #tpu.memory_space<vmem>>, vector<1x256xf32>,
    return
  }
  func.func @transform_0(%arg0: i32) -> (i32, i32) {
    %c0_i32 = arith.constant 0 : i32
    %c0_i32_0 = arith.constant 0 : i32
    return %arg0, %c0_i32 : i32, i32
  }
  func.func @transform_1(%arg0: i32) -> (i32, i32) {
    %c0_i32 = arith.constant 0 : i32
    %c0_i32_0 = arith.constant 0 : i32
    %c0_i32_1 = arith.constant 0 : i32
    return %c0_i32, %c0_i32_0 : i32, i32
  }
  func.func @transform_2(%arg0: i32) -> (i32, i32) {
    %c0_i32 = arith.constant 0 : i32
    %c0_i32_0 = arith.constant 0 : i32
    %c0_i32_1 = arith.constant 0 : i32
    return %c0_i32, %c0_i32_0 : i32, i32
  }
  func.func @transform_3(%arg0: i32) -> (i32, i32) {
    %c0_i32 = arith.constant 0 : i32
    %c0_i32_0 = arith.constant 0 : i32
    %c0_i32_1 = arith.constant 0 : i32
    return %c0_i32, %c0_i32_0 : i32, i32
  }
  func.func @transform_4(%arg0: i32) -> (i32, i32) {
    %c0_i32 = arith.constant 0 : i32
    %c0_i32_0 = arith.constant 0 : i32
    %c0_i32_1 = arith.constant 0 : i32
    return %c0_i32, %c0_i32_0 : i32, i32
  }
  func.func @transform_5(%arg0: i32) -> (i32, i32) {
    %c0_i32 = arith.constant 0 : i32
    %c0_i32_0 = arith.constant 0 : i32
    %c0_i32_1 = arith.constant 0 : i32
    return %c0_i32, %c0_i32_0 : i32, i32
  }
  func.func @transform_6(%arg0: i32) -> (i32, i32) {
    %c0_i32 = arith.constant 0 : i32
    %c0_i32_0 = arith.constant 0 : i32
    %c0_i32_1 = arith.constant 0 : i32
    return %c0_i32, %c0_i32_0 : i32, i32
  }
  func.func @transform_7(%arg0: i32) -> (i32, i32) {
    %c0_i32 = arith.constant 0 : i32
    %c0_i32_0 = arith.constant 0 : i32
    %c0_i32_1 = arith.constant 0 : i32
    return %c0_i32, %c0_i32_0 : i32, i32
  }
  func.func @transform_8(%arg0: i32) -> (i32, i32) {
    %c0_i32 = arith.constant 0 : i32
    %c0_i32_0 = arith.constant 0 : i32
    %c0_i32_1 = arith.constant 0 : i32
    return %c0_i32, %c0_i32_0 : i32, i32
  }
  func.func @transform_9(%arg0: i32) -> (i32, i32) {
    %c0_i32 = arith.constant 0 : i32
    %c0_i32_0 = arith.constant 0 : i32
    %c0_i32_1 = arith.constant 0 : i32
    return %c0_i32, %c0_i32_0 : i32, i32
  }
  func.func @transform_10(%arg0: i32) -> (i32, i32) {
    %c0_i32 = arith.constant 0 : i32
    %c0_i32_0 = arith.constant 0 : i32
    %c0_i32_1 = arith.constant 0 : i32
    return %c0_i32, %c0_i32_0 : i32, i32
  }
  func.func @transform_11(%arg0: i32) -> (i32, i32) {
    %c0_i32 = arith.constant 0 : i32
    %c0_i32_0 = arith.constant 0 : i32
    return %c0_i32, %arg0 : i32, i32
  }
}

</mosaic_0001>

<bundles_post_ra>
// kernel: hybrid_qnn_forward.1
= control target key start
LH: loop header
LB: loop body
LE: loop exit
PB: predicated region body
PF: predicated region fallthrough
CT: control target
= control target key end

     0   :  { %s2692_s17 = smov 0   ;;  %s3538_s0 = inlined_call_operand.vmem [shape: f32[512,1], index: 0, kind: input, shape index: {}]   ;;  %s3539_s1 = inlined_call_operand.vmem [shape: f32[1,256], index: 1, kind: input, shape index: {}]   ;;  %s3540_s2 = inlined_call_operand.vmem [shape: f32[1,256], index: 2, kind: input, shape index: {}]   ;;  %s3541_s3 = inlined_call_operand.vmem [shape: f32[256,128], index: 3, kind: input, shape index: {}]   ;;  %s3542_s4 = inlined_call_operand.vmem [shape: f32[1,128], index: 4, kind: input, shape index: {}]   ;;  %s3543_s5 = inlined_call_operand.vmem [shape: f32[128,64], index: 5, kind: input, shape index: {}]   ;;  %s3544_s6 = inlined_call_operand.vmem [shape: f32[1,64], index: 6, kind: input, shape index: {}]   ;;  %s3545_s7 = inlined_call_operand.vmem [shape: f32[64,32], index: 7, kind: input, shape index: {}]   ;;  %s3546_s8 = inlined_call_operand.vmem [shape: f32[1,32], index: 8, kind: input, shape index: {}]   ;;  %s3547_s9 = inlined_call_operand.vmem [shape: f32[2,32], index: 9, kind: input, shape index: {}]   ;;  %s3548_s10 = inlined_call_operand.vmem [shape: f32[2,1], index: 10, kind: input, shape index: {}]   ;;  %s3549_s11 = inlined_call_operand.vmem [shape: f32[1,512], index: 11, kind: output, shape index: {}]  }
   0x1 LB: > { %s2220_s18 = sadd.s32 4294967295, %s2621_s17   ;;  %p2224_p0 = scmp.ge.s32.totalorder %s2621_s17, 1  ;;  %s2621_s17 = sphi %s2692_s17, %s21_s17  }
   0x2   : > { %p338_p1 = scmp.lt.s32.totalorder %s2621_s17, 3 }
   0x4   : > { %p339_p2 = pnand %p2224_p0, %p338_p1 }
   0x5   : > { %s2225_s19 = sshll.u32 (!%p339_p2), %s2220_s18, 5  ;;  %s2227_s14 = sshll.u32 (!%p339_p2), %s2220_s18, 1 }
   0x6   : > { %342 = sbr.rel (%p339_p2) target bundleno = 1263 (0x4ef), region = 64  ;;  %p378_p3 = scmp.lt.s32.totalorder (!%p339_p2), %s2225_s19, 63 }
   0x7   : > { %p384_p4 = scmp.lt.s32.totalorder (!%p339_p2), %s2227_s14, 3 }
   0xb   : > { %v811_v0 = vld [vmem:[%s3541_s3 + $0x78] sm:$0xff]  ;;  %v2623_v1 = vmov 0   ;;  %v2624_v2 = vmov 0.0   ;;  %v810_v3 = vld [vmem:[%s3541_s3 + $0x70] sm:$0xff]  ;;  %s3555_s19 = smov (!%p378_p3, %s2225_s19), 63  ;;  %v809_v4 = vld [vmem:[%s3541_s3 + $0x68] sm:$0xff] }
   0xc   : > { %2598 = vset.pattern.permute.xlu1 %v2623_v1  ;;  %2597 = vset.pattern.permute.xlu0 %v2623_v1  ;;  %s2226_s26 = sshll.u32 %s3555_s19, 3  ;;  %v808_v7 = vld [vmem:[%s3541_s3 + $0x60] sm:$0xff]  ;;  %v807_v10 = vld [vmem:[%s3541_s3 + $0x58] sm:$0xff]  ;;  %v806_v11 = vld [vmem:[%s3541_s3 + $0x50] sm:$0xff]  ;;  %vm1387_vm0 = vcmask 523264   ;;  %vm1748_vm1 = vcmask 261120  }
   0xd   : > { %835 = vmatprep.subr.mxu0 %v2624_v2  ;;  %s2716_s29 = scalar_lea.vmem %s3538_s0, %s2226_s26  ;;  %v805_v14 = vld [vmem:[%s3541_s3 + $0x48] sm:$0xff]  ;;  %v804_v17 = vld [vmem:[%s3541_s3 + $0x40] sm:$0xff]  ;;  %v803_v18 = vld [vmem:[%s3541_s3 + $0x38] sm:$0xff]  ;;  %s3557_s14 = smov (!%p384_p4, %s2227_s14), 3 }
   0xe   : > { %836 = vmatpush1.msra.mxu0 %v811_v0  ;;  %v390_v5 = vld [vmem:[%s2716_s29 + $0x10] sm:$0xff]  ;;  %v388_v6 = vld [vmem:[%s2716_s29] sm:$0xff]  ;;  %v391_v8 = vld [vmem:[%s2716_s29 + $0x18] sm:$0xff]  ;;  %s386_s19 = scalar_lea.vmem %s3549_s11, %s3557_s14 }
   0xf   : > { %837 = vmatprep.subr.mxu0 %v2624_v2  ;;  %433 = vperm.xlu1 %2598, %v390_v5   ;;  %v389_v9 = vld [vmem:[%s2716_s29 + $0x8] sm:$0xff]  ;;  %v392_v13 = vld [vmem:[%s2716_s29 + $0x20] sm:$0xff]  ;;  %v395_v15 = vld [vmem:[%s2716_s29 + $0x38] sm:$0xff] }
  0x10   : > { %838 = vmatpush1.msra.mxu0 %v810_v3  ;;  %423 = vperm.xlu0 %2597, %v388_v6   ;;  %v393_v12 = vld [vmem:[%s2716_s29 + $0x28] sm:$0xff]  ;;  %v394_v16 = vld [vmem:[%s2716_s29 + $0x30] sm:$0xff]  ;;  %v396_v20 = vld [vmem:[%s2716_s29 + $0x40] sm:$0xff] }
  0x11   : > { %839 = vmatprep.subr.mxu0 %v2624_v2  ;;  %v397_v19 = vld [vmem:[%s2716_s29 + $0x48] sm:$0xff]  ;;  %v802_v21 = vld [vmem:[%s3541_s3 + $0x30] sm:$0xff]  ;;  %v399_v22 = vld [vmem:[%s2716_s29 + $0x58] sm:$0xff] }
  0x12   : > { %840 = vmatpush1.msra.mxu0 %v809_v4  ;;  %v398_v23 = vld [vmem:[%s2716_s29 + $0x50] sm:$0xff]  ;;  %v801_v24 = vld [vmem:[%s3541_s3 + $0x28] sm:$0xff]  ;;  %v800_v25 = vld [vmem:[%s3541_s3 + $0x20] sm:$0xff]  ;;  %v582_v4 = vlaneseq }
  0x13   : > { %841 = vmatprep.subr.mxu0 %v2624_v2  ;;  %438 = vperm.xlu1 %2598, %v391_v8   ;;  %v401_v26 = vld [vmem:[%s2716_s29 + $0x68] sm:$0xff]  ;;  %v400_v27 = vld [vmem:[%s2716_s29 + $0x60] sm:$0xff]  ;;  %v799_v28 = vld [vmem:[%s3541_s3 + $0x18] sm:$0xff] }
  0x14   : > { %842 = vmatpush1.msra.mxu0 %v808_v7  ;;  %428 = vperm.xlu0 %2597, %v389_v9   ;;  %v403_v29 = vld [vmem:[%s2716_s29 + $0x78] sm:$0xff]  ;;  %v402_v30 = vld [vmem:[%s2716_s29 + $0x70] sm:$0xff]  ;;  %v797_v32 = vld [vmem:[%s3541_s3 + $0x8] sm:$0xff]  ;;  %v2871_v5 = vshrl.u32 %v582_v4, 7 }
  0x15   : > { %843 = vmatprep.subr.mxu0 %v2624_v2  ;;  %v798_v31 = vld [vmem:[%s3541_s3 + $0x10] sm:$0xff]  ;;  %v405_v33 = vld [vmem:[%s2716_s29 + $0x88] sm:$0xff]  ;;  %v404_v34 = vld [vmem:[%s2716_s29 + $0x80] sm:$0xff] }
  0x16   : > { %844 = vmatpush1.msra.mxu0 %v807_v10  ;;  %v796_v35 = vld [vmem:[%s3541_s3] sm:$0xff]  ;;  %v407_v36 = vld [vmem:[%s2716_s29 + $0x98] sm:$0xff]  ;;  %v406_v37 = vld [vmem:[%s2716_s29 + $0x90] sm:$0xff]  ;;  %v584_v6 = vsub.s32 0, %v2871_v5  ;;  %v588_v7 = vsub.s32 1, %v2871_v5 }
  0x17   : > { %845 = vmatprep.subr.mxu0 %v2624_v2  ;;  %448 = vperm.xlu1 %2598, %v393_v12   ;;  %v827_v38 = vld [vmem:[%s3541_s3 + $0xf8] sm:$0xff]  ;;  %v826_v39 = vld [vmem:[%s3541_s3 + $0xf0] sm:$0xff]  ;;  %v409_v40 = vld [vmem:[%s2716_s29 + $0xa8] sm:$0xff] }
  0x18   : > { %846 = vmatpush1.msra.mxu0 %v806_v11  ;;  %443 = vperm.xlu0 %2597, %v392_v13   ;;  %v408_v41 = vld [vmem:[%s2716_s29 + $0xa0] sm:$0xff]  ;;  %v825_v42 = vld [vmem:[%s3541_s3 + $0xe8] sm:$0xff]  ;;  %v411_v43 = vld [vmem:[%s2716_s29 + $0xb8] sm:$0xff] }
  0x19   : > { %847 = vmatprep.subr.mxu0 %v2624_v2  ;;  %v410_v44 = vld [vmem:[%s2716_s29 + $0xb0] sm:$0xff]  ;;  %v824_v45 = vld [vmem:[%s3541_s3 + $0xe0] sm:$0xff]  ;;  %v823_v46 = vld [vmem:[%s3541_s3 + $0xd8] sm:$0xff] }
  0x1a   : > { %848 = vmatpush1.msra.mxu0 %v805_v14  ;;  %v413_v47 = vld [vmem:[%s2716_s29 + $0xc8] sm:$0xff]  ;;  %v412_v48 = vld [vmem:[%s2716_s29 + $0xc0] sm:$0xff]  ;;  %v822_v49 = vld [vmem:[%s3541_s3 + $0xd0] sm:$0xff] }
  0x1b   : > { %849 = vmatprep.subr.mxu0 %v2624_v2  ;;  %458 = vperm.xlu1 %2598, %v395_v15   ;;  %v415_v50 = vld [vmem:[%s2716_s29 + $0xd8] sm:$0xff]  ;;  %v414_v51 = vld [vmem:[%s2716_s29 + $0xd0] sm:$0xff]  ;;  %v821_v52 = vld [vmem:[%s3541_s3 + $0xc8] sm:$0xff] }
  0x1c   : > { %453 = vperm.xlu0 %2597, %v394_v16   ;;  %850 = vmatpush1.msra.mxu0 %v804_v17  ;;  %v820_v53 = vld [vmem:[%s3541_s3 + $0xc0] sm:$0xff]  ;;  %v417_v54 = vld [vmem:[%s2716_s29 + $0xe8] sm:$0xff]  ;;  %v819_v56 = vld [vmem:[%s3541_s3 + $0xb8] sm:$0xff] }
  0x1d   : > { %851 = vmatprep.subr.mxu0 %v2624_v2  ;;  %v416_v55 = vld [vmem:[%s2716_s29 + $0xe0] sm:$0xff]  ;;  %v419_v57 = vld [vmem:[%s2716_s29 + $0xf8] sm:$0xff]  ;;  %v418_v58 = vld [vmem:[%s2716_s29 + $0xf0] sm:$0xff] }
  0x1e   : > { %852 = vmatpush1.msra.mxu0 %v803_v18  ;;  %v818_v59 = vld [vmem:[%s3541_s3 + $0xb0] sm:$0xff]  ;;  %v817_v60 = vld [vmem:[%s3541_s3 + $0xa8] sm:$0xff]  ;;  %v1742_v61 = vld [vmem:[%s3548_s10] sm:$0x3] }
  0x1f   : > { %468 = vperm.xlu1 %2598, %v397_v19   ;;  %853 = vmatprep.subr.mxu0 %v2624_v2  ;;  %v816_v62 = vld [vmem:[%s3541_s3 + $0xa0] sm:$0xff]  ;;  %v815_v63 = vld [vmem:[%s3541_s3 + $0x98] sm:$0xff]  ;;  %v814_v0 = vld [vmem:[%s3541_s3 + $0x90] sm:$0xff] }
  0x20   : > { %463 = vperm.xlu0 %2597, %v396_v20   ;;  %854 = vmatpush1.msra.mxu0 %v802_v21  ;;  %v813_v1 = vld [vmem:[%s3541_s3 + $0x88] sm:$0xff]  ;;  %v812_v3 = vld [vmem:[%s3541_s3 + $0x80] sm:$0xff] }
  0x21   : > { %855 = vmatprep.subr.mxu0 %v2624_v2  ;;  %v420_v8 = vld [vmem:[%s3539_s1] sm:$0x3] }
  0x22   : > { %856 = vmatpush1.msra.mxu0 %v801_v24  ;;  %v656_v9 = vld [vmem:[%s3540_s2] sm:$0x3]  ;;  %v2881_v10 = vrot.slane %v420_v8, %v584_v6 }
  0x23   : > { %478 = vperm.xlu1 %2598, %v399_v22   ;;  %857 = vmatprep.subr.mxu0 %v2624_v2  ;;  %v2885_v11 = vrot.slane %v656_v9, %v584_v6  ;;  %v2887_v12 = vrot.slane %v656_v9, %v588_v7 }
  0x24   : > { %473 = vperm.xlu0 %2597, %v398_v23   ;;  %858 = vmatpush1.msra.mxu0 %v800_v25  ;;  %v1107_v25 = vld [vmem:[%s3543_s5 + $0x78] sm:$0xff] }
  0x25   : > { %859 = vmatprep.subr.mxu0 %v2624_v2  ;;  %2428 = vmatprep.subr.mxu1 %v1107_v25 }
  0x26   : > { %860 = vmatpush1.msra.mxu0 %v799_v28  ;;  %2429 = vmatpush3.msra.mxu1 %v1107_v25 }
  0x27   : > { %488 = vperm.xlu1 %2598, %v401_v26   ;;  %861 = vmatprep.subr.mxu0 %v2624_v2  ;;  %v1106_v26 = vld [vmem:[%s3543_s5 + $0x70] sm:$0xff] }
  0x28   : > { %483 = vperm.xlu0 %2597, %v400_v27   ;;  %862 = vmatpush1.msra.mxu0 %v798_v31 }
  0x29   : > { %863 = vmatprep.subr.mxu0 %v2624_v2  ;;  %2430 = vmatprep.subr.mxu1 %v1106_v26 }
  0x2a   : > { %864 = vmatpush1.msra.mxu0 %v797_v32  ;;  %2431 = vmatpush3.msra.mxu1 %v1106_v26  ;;  %v1097_v26 = vld [vmem:[%s3543_s5 + $0x28] sm:$0xff] }
  0x2b   : > { %498 = vperm.xlu1 %2598, %v403_v29   ;;  %865 = vmatprep.subr.mxu0 %v2624_v2 }
  0x2c   : > { %493 = vperm.xlu0 %2597, %v402_v30   ;;  %866 = vmatpush1.msra.mxu0 %v796_v35  ;;  %v1105_v35 = vld [vmem:[%s3543_s5 + $0x68] sm:$0xff] }
  0x2d   : > { %867 = vmatprep.subr.mxu0 %v2624_v2  ;;  %2432 = vmatprep.subr.mxu1 %v1105_v35 }
  0x2e   : > { %868 = vmatpush2.msra.mxu0 %v827_v38  ;;  %2433 = vmatpush3.msra.mxu1 %v1105_v35  ;;  %v1096_v35 = vld [vmem:[%s3543_s5 + $0x20] sm:$0xff] }
  0x2f   : > { %508 = vperm.xlu1 %2598, %v405_v33   ;;  %869 = vmatprep.subr.mxu0 %v2624_v2 }
  0x30   : > { %503 = vperm.xlu0 %2597, %v404_v34   ;;  %870 = vmatpush2.msra.mxu0 %v826_v39 }
  0x31   : > { %871 = vmatprep.subr.mxu0 %v2624_v2 }
  0x32   : > { %872 = vmatpush2.msra.mxu0 %v825_v42 }
  0x33   : > { %518 = vperm.xlu1 %2598, %v407_v36   ;;  %873 = vmatprep.subr.mxu0 %v2624_v2 }
  0x34   : > { %513 = vperm.xlu0 %2597, %v406_v37   ;;  %874 = vmatpush2.msra.mxu0 %v824_v45 }
  0x35   : > { %875 = vmatprep.subr.mxu0 %v2624_v2 }
  0x36   : > { %876 = vmatpush2.msra.mxu0 %v823_v46 }
  0x37   : > { %528 = vperm.xlu1 %2598, %v409_v40   ;;  %877 = vmatprep.subr.mxu0 %v2624_v2 }
  0x38   : > { %523 = vperm.xlu0 %2597, %v408_v41   ;;  %878 = vmatpush2.msra.mxu0 %v822_v49  ;;  %v1104_v41 = vld [vmem:[%s3543_s5 + $0x60] sm:$0xff] }
  0x39   : > { %879 = vmatprep.subr.mxu0 %v2624_v2  ;;  %2434 = vmatprep.subr.mxu1 %v1104_v41 }
  0x3a   : > { %880 = vmatpush2.msra.mxu0 %v821_v52  ;;  %2435 = vmatpush3.msra.mxu1 %v1104_v41 }
  0x3b   : > { %538 = vperm.xlu1 %2598, %v411_v43   ;;  %881 = vmatprep.subr.mxu0 %v2624_v2 }
  0x3c   : > { %533 = vperm.xlu0 %2597, %v410_v44   ;;  %882 = vmatpush2.msra.mxu0 %v820_v53 }
  0x3d   : > { %883 = vmatprep.subr.mxu0 %v2624_v2 }
  0x3e   : > { %884 = vmatpush2.msra.mxu0 %v819_v56 }
  0x3f   : > { %548 = vperm.xlu1 %2598, %v413_v47   ;;  %885 = vmatprep.subr.mxu0 %v2624_v2  ;;  %v1103_v47 = vld [vmem:[%s3543_s5 + $0x58] sm:$0xff] }
  0x40   : > { %543 = vperm.xlu0 %2597, %v412_v48   ;;  %886 = vmatpush2.msra.mxu0 %v818_v59  ;;  %v1101_v59 = vld [vmem:[%s3543_s5 + $0x48] sm:$0xff] }
  0x41   : > { %887 = vmatprep.subr.mxu0 %v2624_v2  ;;  %2436 = vmatprep.subr.mxu1 %v1103_v47 }
  0x42   : > { %888 = vmatpush2.msra.mxu0 %v817_v60  ;;  %2437 = vmatpush3.msra.mxu1 %v1103_v47 }
  0x43   : > { %558 = vperm.xlu1 %2598, %v415_v50   ;;  %889 = vmatprep.subr.mxu0 %v2624_v2 }
  0x44   : > { %553 = vperm.xlu0 %2597, %v414_v51   ;;  %890 = vmatpush2.msra.mxu0 %v816_v62 }
  0x45   : > { %891 = vmatprep.subr.mxu0 %v2624_v2 }
  0x46   : > { %892 = vmatpush2.msra.mxu0 %v815_v63 }
  0x47   : > { %568 = vperm.xlu1 %2598, %v417_v54   ;;  %893 = vmatprep.subr.mxu0 %v2624_v2 }
  0x48   : > { %563 = vperm.xlu0 %2597, %v416_v55   ;;  %894 = vmatpush2.msra.mxu0 %v814_v0  ;;  %v1102_v55 = vld [vmem:[%s3543_s5 + $0x50] sm:$0xff] }
  0x49   : > { %895 = vmatprep.subr.mxu0 %v2624_v2  ;;  %2438 = vmatprep.subr.mxu1 %v1102_v55 }
  0x4a   : > { %896 = vmatpush2.msra.mxu0 %v813_v1  ;;  %2439 = vmatpush3.msra.mxu1 %v1102_v55  ;;  %v1100_v1 = vld [vmem:[%s3543_s5 + $0x40] sm:$0xff] }
  0x4b   : > { %578 = vperm.xlu1 %2598, %v419_v57   ;;  %897 = vmatprep.subr.mxu0 %v2624_v2  ;;  %v2883_v2 = vrot.slane %v420_v8, %v588_v7 }
  0x4c   : > { %573 = vperm.xlu0 %2597, %v418_v58   ;;  %898 = vmatpush2.msra.mxu0 %v812_v3 }
  0x4d   : > { %2440 = vmatprep.subr.mxu1 %v1101_v59 }
  0x4e   : > { %2441 = vmatpush3.msra.mxu1 %v1101_v59 }
  0x4f   : > { %2442 = vmatprep.subr.mxu1 %v1100_v1 }
  0x50   : > { %1745 = vperm.xlu0 %2597, %v1742_v61   ;;  %2443 = vmatpush3.msra.mxu1 %v1100_v1 }
  0x8a   : > { %v434_v13 = vpop.permute.xlu1 %433 }
  0x8b   : > { %v424_v14 = vpop.permute.xlu0 %423  ;;  %v597_v17 = vmul.f32 %v2883_v2, %v434_v13  ;;  %v596_v22 = vmul.f32 %v2881_v10, %v434_v13 }
  0x8c   : > { %v592_v15 = vmul.f32 %v2881_v10, %v424_v14  ;;  %v593_v16 = vmul.f32 %v2883_v2, %v424_v14 }
  0x8d   : > { %v673_v27 = vadd.f32 %v2887_v12, %v597_v17  ;;  %v672_v36 = vadd.f32 %v2885_v11, %v596_v22 }
  0x8e   : > { %v668_v18 = vadd.f32 %v2885_v11, %v592_v15  ;;  %v669_v19 = vadd.f32 %v2887_v12, %v593_v16  ;;  %v439_v20 = vpop.permute.xlu1 %438  ;;  %v1099_v16 = vld [vmem:[%s3543_s5 + $0x38] sm:$0xff] }
  0x8f   : > { %v429_v21 = vpop.permute.xlu0 %428  ;;  %v599_v32 = vmul.f32 %v2883_v2, %v439_v20  ;;  %v737_v39 = vmax.f32 %v673_v27, 0.0  ;;  %v598_v40 = vmul.f32 %v2881_v10, %v439_v20  ;;  %v736_v46 = vmax.f32 %v672_v36, 0.0  ;;  %2444 = vmatprep.subr.mxu1 %v1099_v16  ;;  %v1098_v20 = vld [vmem:[%s3543_s5 + $0x30] sm:$0xff] }
  0x90   : > { %v594_v23 = vmul.f32 %v2881_v10, %v429_v21  ;;  %v595_v24 = vmul.f32 %v2883_v2, %v429_v21  ;;  %v733_v28 = vmax.f32 %v669_v19, 0.0  ;;  %v732_v29 = vmax.f32 %v668_v18, 0.0  ;;  %2445 = vmatpush3.msra.mxu1 %v1099_v16 }
  0x91   : > { %v675_v42 = vadd.f32 %v2887_v12, %v599_v32  ;;  %v674_v48 = vadd.f32 %v2885_v11, %v598_v40  ;;  %2446 = vmatprep.subr.mxu1 %v1098_v20 }
  0x92   : > { %v670_v30 = vadd.f32 %v2885_v11, %v594_v23  ;;  %v671_v31 = vadd.f32 %v2887_v12, %v595_v24  ;;  %899 = vmatprep.mubr.f32.mxu0 %v733_v28  ;;  %v449_v33 = vpop.permute.xlu1 %448  ;;  %2447 = vmatpush3.msra.mxu1 %v1098_v20 }
  0x93   : > { %v444_v34 = vpop.permute.xlu0 %443  ;;  %900 = vmatmul.mubr.f32.vlgmr.msra.gmra.mxu0 %v732_v29  ;;  %v603_v50 = vmul.f32 %v2883_v2, %v449_v33  ;;  %v739_v54 = vmax.f32 %v675_v42, 0.0  ;;  %v602_v56 = vmul.f32 %v2881_v10, %v449_v33  ;;  %v738_v58 = vmax.f32 %v674_v48, 0.0  ;;  %2448 = vmatprep.subr.mxu1 %v1097_v26 }
  0x94   : > { %v735_v37 = vmax.f32 %v671_v31, 0.0  ;;  %v734_v38 = vmax.f32 %v670_v30, 0.0  ;;  %v601_v43 = vmul.f32 %v2883_v2, %v444_v34  ;;  %v600_v49 = vmul.f32 %v2881_v10, %v444_v34  ;;  %2449 = vmatpush3.msra.mxu1 %v1097_v26 }
  0x95   : > { %v679_v60 = vadd.f32 %v2887_v12, %v603_v50  ;;  %v678_v3 = vadd.f32 %v2885_v11, %v602_v56  ;;  %2450 = vmatprep.subr.mxu1 %v1096_v35 }
  0x96   : > { %904 = vmatprep.mubr.f32.mxu0 %v735_v37  ;;  %v459_v44 = vpop.permute.xlu1 %458  ;;  %v677_v51 = vadd.f32 %v2887_v12, %v601_v43  ;;  %v676_v57 = vadd.f32 %v2885_v11, %v600_v49  ;;  %2451 = vmatpush3.msra.mxu1 %v1096_v35 }
  0x97   : > { %v454_v45 = vpop.permute.xlu0 %453  ;;  %905 = vmatmul.mubr.f32.gmra.mxu0 %v734_v38  ;;  %v607_v8 = vmul.f32 %v2883_v2, %v459_v44  ;;  %v743_v15 = vmax.f32 %v679_v60, 0.0  ;;  %v606_v17 = vmul.f32 %v2881_v10, %v459_v44  ;;  %v742_v19 = vmax.f32 %v678_v3, 0.0 }
  0x98   : > { %909 = vmatprep.mubr.f32.mxu0 %v737_v39  ;;  %v605_v61 = vmul.f32 %v2883_v2, %v454_v45  ;;  %v741_v0 = vmax.f32 %v677_v51, 0.0  ;;  %v604_v6 = vmul.f32 %v2881_v10, %v454_v45  ;;  %v740_v7 = vmax.f32 %v676_v57, 0.0 }
  0x99   : > { %v683_v21 = vadd.f32 %v2887_v12, %v607_v8  ;;  %v682_v28 = vadd.f32 %v2885_v11, %v606_v17 }
  0x9a   : > { %v2924_v52 = vpop.permute.xlu1 %468  ;;  %v681_v9 = vadd.f32 %v2887_v12, %v605_v61  ;;  %v680_v18 = vadd.f32 %v2885_v11, %v604_v6 }
  0x9b   : > { %v464_v53 = vpop.permute.xlu0 %463  ;;  %910 = vmatmul.mubr.f32.gmra.mxu0 %v736_v46  ;;  %v611_v30 = vmul.f32 %v2883_v2, %v2924_v52  ;;  %v747_v34 = vmax.f32 %v683_v21, 0.0  ;;  %v610_v39 = vmul.f32 %v2881_v10, %v2924_v52  ;;  %v746_v44 = vmax.f32 %v682_v28, 0.0 }
  0x9c   : > { %914 = vmatprep.mubr.f32.mxu0 %v739_v54  ;;  %v609_v22 = vmul.f32 %v2883_v2, %v464_v53  ;;  %v745_v25 = vmax.f32 %v681_v9, 0.0  ;;  %v608_v27 = vmul.f32 %v2881_v10, %v464_v53  ;;  %v744_v29 = vmax.f32 %v680_v18, 0.0 }
  0x9d   : > { %v687_v45 = vadd.f32 %v2887_v12, %v611_v30  ;;  %v686_v54 = vadd.f32 %v2885_v11, %v610_v39 }
  0x9e   : > { %v2936_v62 = vpop.permute.xlu1 %478  ;;  %v685_v31 = vadd.f32 %v2887_v12, %v609_v22  ;;  %v684_v40 = vadd.f32 %v2885_v11, %v608_v27 }
  0x9f   : > { %v2938_v63 = vpop.permute.xlu0 %473  ;;  %915 = vmatmul.mubr.f32.gmra.mxu0 %v738_v58  ;;  %v615_v61 = vmul.f32 %v2883_v2, %v2936_v62  ;;  %v751_v3 = vmax.f32 %v687_v45, 0.0  ;;  %v750_v17 = vmax.f32 %v686_v54, 0.0 }
  0xa0   : > { %919 = vmatprep.mubr.f32.mxu0 %v741_v0  ;;  %v613_v46 = vmul.f32 %v2883_v2, %v2938_v63  ;;  %v749_v49 = vmax.f32 %v685_v31, 0.0  ;;  %v612_v55 = vmul.f32 %v2881_v10, %v2938_v63  ;;  %v748_v56 = vmax.f32 %v684_v40, 0.0 }
  0xa1   : > { %v691_v22 = vadd.f32 %v2887_v12, %v615_v61 }
  0xa2   : > { %v2947_v13 = vpop.permute.xlu1 %488  ;;  %v689_v0 = vadd.f32 %v2887_v12, %v613_v46  ;;  %v688_v16 = vadd.f32 %v2885_v11, %v612_v55 }
  0xa3   : > { %v2949_v14 = vpop.permute.xlu0 %483  ;;  %920 = vmatmul.mubr.f32.gmra.mxu0 %v740_v7  ;;  %v619_v40 = vmul.f32 %v2883_v2, %v2947_v13  ;;  %v755_v46 = vmax.f32 %v691_v22, 0.0 }
  0xa4   : > { %924 = vmatprep.mubr.f32.mxu0 %v743_v15  ;;  %v614_v15 = vmul.f32 %v2881_v10, %v2936_v62  ;;  %v617_v62 = vmul.f32 %v2883_v2, %v2949_v14  ;;  %v753_v27 = vmax.f32 %v689_v0, 0.0  ;;  %v752_v35 = vmax.f32 %v688_v16, 0.0 }
  0xa5   : > { %v695_v0 = vadd.f32 %v2887_v12, %v619_v40 }
  0xa6   : > { %v2961_v23 = vpop.permute.xlu1 %498 }
  0xa7   : > { %v2963_v24 = vpop.permute.xlu0 %493  ;;  %925 = vmatmul.mubr.f32.gmra.mxu0 %v742_v19  ;;  %v622_v40 = vmul.f32 %v2881_v10, %v2961_v23 }
  0xa8   : > { %929 = vmatprep.mubr.f32.mxu0 %v745_v25  ;;  %v620_v16 = vmul.f32 %v2881_v10, %v2963_v24 }
  0xaa   : > { %v509_v32 = vpop.permute.xlu1 %508 }
  0xab   : > { %v2973_v33 = vpop.permute.xlu0 %503  ;;  %v626_v36 = vmul.f32 %v2881_v10, %v509_v32  ;;  %v627_v37 = vmul.f32 %v2883_v2, %v509_v32  ;;  %930 = vmatmul.mubr.f32.gmra.mxu0 %v744_v29  ;;  %v690_v32 = vadd.f32 %v2885_v11, %v614_v15 }
  0xac   : > { %v624_v38 = vmul.f32 %v2881_v10, %v2973_v33  ;;  %934 = vmatprep.mubr.f32.mxu0 %v747_v34  ;;  %v616_v34 = vmul.f32 %v2881_v10, %v2949_v14 }
  0xad   : > { %v2986_v41 = vadd.f32 %v2885_v11, %v626_v36  ;;  %v2989_v42 = vadd.f32 %v2887_v12, %v627_v37 }
  0xae   : > { %v2992_v43 = vadd.f32 %v2885_v11, %v624_v38  ;;  %v519_v47 = vpop.permute.xlu1 %518 }
  0xaf   : > { %v514_v48 = vpop.permute.xlu0 %513  ;;  %v630_v50 = vmul.f32 %v2881_v10, %v519_v47  ;;  %v631_v51 = vmul.f32 %v2883_v2, %v519_v47  ;;  %935 = vmatmul.mubr.f32.gmra.mxu0 %v746_v44  ;;  %v693_v44 = vadd.f32 %v2887_v12, %v617_v62 }
  0xb0   : > { %v628_v52 = vmul.f32 %v2881_v10, %v514_v48  ;;  %v629_v53 = vmul.f32 %v2883_v2, %v514_v48  ;;  %939 = vmatprep.mubr.f32.mxu0 %v749_v49 }
  0xb1   : > { %v3005_v57 = vadd.f32 %v2885_v11, %v630_v50  ;;  %v3008_v58 = vadd.f32 %v2887_v12, %v631_v51  ;;  %v618_v51 = vmul.f32 %v2881_v10, %v2947_v13  ;;  %v621_v13 = vmul.f32 %v2883_v2, %v2963_v24 }
  0xb2   : > { %v3011_v59 = vadd.f32 %v2885_v11, %v628_v52  ;;  %v3014_v60 = vadd.f32 %v2887_v12, %v629_v53  ;;  %v529_v63 = vpop.permute.xlu1 %528  ;;  %v692_v52 = vadd.f32 %v2885_v11, %v616_v34  ;;  %v754_v53 = vmax.f32 %v690_v32, 0.0 }
  0xb3   : > { %v524_v1 = vpop.permute.xlu0 %523  ;;  %v634_v6 = vmul.f32 %v2881_v10, %v529_v63  ;;  %v635_v7 = vmul.f32 %v2883_v2, %v529_v63  ;;  %940 = vmatmul.mubr.f32.gmra.mxu0 %v748_v56  ;;  %v694_v15 = vadd.f32 %v2885_v11, %v618_v51 }
  0xb4   : > { %v632_v8 = vmul.f32 %v2881_v10, %v524_v1  ;;  %v633_v9 = vmul.f32 %v2883_v2, %v524_v1  ;;  %944 = vmatprep.mubr.f32.mxu0 %v751_v3  ;;  %v757_v3 = vmax.f32 %v693_v44, 0.0  ;;  %v696_v44 = vadd.f32 %v2885_v11, %v620_v16 }
  0xb5   : > { %v3027_v18 = vadd.f32 %v2885_v11, %v634_v6  ;;  %v3030_v19 = vadd.f32 %v2887_v12, %v635_v7  ;;  %v764_v16 = vmax.f32 %v2992_v43, 0.0  ;;  %v768_v43 = vmax.f32 %v3011_v59, 0.0 }
  0xb6   : > { %v3033_v20 = vadd.f32 %v2885_v11, %v632_v8  ;;  %v3036_v21 = vadd.f32 %v2887_v12, %v633_v9  ;;  %v539_v25 = vpop.permute.xlu1 %538 }
  0xb7   : > { %v534_v26 = vpop.permute.xlu0 %533  ;;  %v638_v28 = vmul.f32 %v2881_v10, %v539_v25  ;;  %v639_v29 = vmul.f32 %v2883_v2, %v539_v25  ;;  %945 = vmatmul.mubr.f32.gmra.mxu0 %v750_v17  ;;  %v756_v17 = vmax.f32 %v692_v52, 0.0  ;;  %v775_v59 = vmax.f32 %v3030_v19, 0.0 }
  0xb8   : > { %v636_v30 = vmul.f32 %v2881_v10, %v534_v26  ;;  %v637_v31 = vmul.f32 %v2883_v2, %v534_v26  ;;  %949 = vmatprep.mubr.f32.mxu0 %v753_v27  ;;  %v623_v27 = vmul.f32 %v2883_v2, %v2961_v23  ;;  %v625_v23 = vmul.f32 %v2883_v2, %v2973_v33 }
  0xb9   : > { %v3049_v36 = vadd.f32 %v2885_v11, %v638_v28  ;;  %v3052_v37 = vadd.f32 %v2887_v12, %v639_v29  ;;  %v697_v28 = vadd.f32 %v2887_v12, %v621_v13 }
  0xba   : > { %v3055_v38 = vadd.f32 %v2885_v11, %v636_v30  ;;  %v3058_v39 = vadd.f32 %v2887_v12, %v637_v31  ;;  %v549_v14 = vpop.permute.xlu1 %548  ;;  %v759_v30 = vmax.f32 %v695_v0, 0.0 }
  0xbb   : > { %v544_v45 = vpop.permute.xlu0 %543  ;;  %v642_v47 = vmul.f32 %v2881_v10, %v549_v14  ;;  %v643_v48 = vmul.f32 %v2883_v2, %v549_v14  ;;  %950 = vmatmul.mubr.f32.gmra.mxu0 %v752_v35  ;;  %v758_v14 = vmax.f32 %v694_v15, 0.0  ;;  %v761_v52 = vmax.f32 %v697_v28, 0.0 }
  0xbc   : > { %v640_v49 = vmul.f32 %v2881_v10, %v544_v45  ;;  %v641_v50 = vmul.f32 %v2883_v2, %v544_v45  ;;  %954 = vmatprep.mubr.f32.mxu0 %v755_v46  ;;  %v769_v28 = vmax.f32 %v3014_v60, 0.0  ;;  %v770_v60 = vmax.f32 %v3005_v57, 0.0 }
  0xbd   : > { %v3071_v54 = vadd.f32 %v2885_v11, %v642_v47  ;;  %v3074_v55 = vadd.f32 %v2887_v12, %v643_v48  ;;  %v779_v57 = vmax.f32 %v3052_v37, 0.0 }
  0xbe   : > { %v3077_v56 = vadd.f32 %v2885_v11, %v640_v49  ;;  %v3080_v61 = vadd.f32 %v2887_v12, %v641_v50  ;;  %v559_v63 = vpop.permute.xlu1 %558  ;;  %v699_v49 = vadd.f32 %v2887_v12, %v623_v27  ;;  %v1094_v27 = vld [vmem:[%s3543_s5 + $0x10] sm:$0xff] }
  0xbf   : > { %v554_v1 = vpop.permute.xlu0 %553  ;;  %v646_v6 = vmul.f32 %v2881_v10, %v559_v63  ;;  %v647_v7 = vmul.f32 %v2883_v2, %v559_v63  ;;  %955 = vmatmul.mubr.f32.gmra.mxu0 %v754_v53 }
  0xc0   : > { %v644_v8 = vmul.f32 %v2881_v10, %v554_v1  ;;  %v645_v9 = vmul.f32 %v2883_v2, %v554_v1  ;;  %959 = vmatprep.mubr.f32.mxu0 %v757_v3  ;;  %v698_v1 = vadd.f32 %v2885_v11, %v622_v40  ;;  %v760_v3 = vmax.f32 %v696_v44, 0.0 }
  0xc1   : > { %v3093_v22 = vadd.f32 %v2885_v11, %v646_v6  ;;  %v3096_v62 = vadd.f32 %v2887_v12, %v647_v7  ;;  %v780_v19 = vmax.f32 %v3077_v56, 0.0 }
  0xc2   : > { %v3099_v25 = vadd.f32 %v2885_v11, %v644_v8  ;;  %v3102_v26 = vadd.f32 %v2887_v12, %v645_v9  ;;  %v569_v24 = vpop.permute.xlu1 %568  ;;  %v763_v9 = vmax.f32 %v699_v49, 0.0 }
  0xc3   : > { %v564_v29 = vpop.permute.xlu0 %563  ;;  %v650_v31 = vmul.f32 %v2881_v10, %v569_v24  ;;  %v651_v32 = vmul.f32 %v2883_v2, %v569_v24  ;;  %960 = vmatmul.mubr.f32.gmra.mxu0 %v756_v17  ;;  %v767_v17 = vmax.f32 %v2989_v42, 0.0  ;;  %v1093_v42 = vld [vmem:[%s3543_s5 + $0x8] sm:$0xff]  ;;  %v771_v24 = vmax.f32 %v3008_v58, 0.0 }
  0xc4   : > { %v648_v34 = vmul.f32 %v2881_v10, %v564_v29  ;;  %v649_v35 = vmul.f32 %v2883_v2, %v564_v29  ;;  %964 = vmatprep.mubr.f32.mxu0 %v759_v30  ;;  %v773_v29 = vmax.f32 %v3036_v21, 0.0  ;;  %v772_v30 = vmax.f32 %v3033_v20, 0.0 }
  0xc5   : > { %v3115_v45 = vadd.f32 %v2885_v11, %v650_v31  ;;  %v3118_v46 = vadd.f32 %v2887_v12, %v651_v32  ;;  %v774_v31 = vmax.f32 %v3027_v18, 0.0  ;;  %v777_v58 = vmax.f32 %v3058_v39, 0.0 }
  0xc6   : > { %v3121_v47 = vadd.f32 %v2885_v11, %v648_v34  ;;  %v3124_v48 = vadd.f32 %v2887_v12, %v649_v35  ;;  %v579_v50 = vpop.permute.xlu1 %578  ;;  %v776_v32 = vmax.f32 %v3055_v38, 0.0  ;;  %v778_v21 = vmax.f32 %v3049_v36, 0.0  ;;  %v3193_v35 = vld [vmem:[%s3542_s4] ss:$0 sm:$0xff] }
  0xc7   : > { %v574_v51 = vpop.permute.xlu0 %573  ;;  %v654_v53 = vmul.f32 %v2881_v10, %v579_v50  ;;  %v655_v0 = vmul.f32 %v2883_v2, %v579_v50  ;;  %965 = vmatmul.mubr.f32.gmra.mxu0 %v758_v14  ;;  %v781_v20 = vmax.f32 %v3080_v61, 0.0  ;;  %v783_v18 = vmax.f32 %v3074_v55, 0.0  ;;  %v1379_v14 = vld [vmem:[%s3545_s7 + $0x38] sm:$0xff] }
  0xc8   : > { %v652_v13 = vmul.f32 %v2881_v10, %v574_v51  ;;  %v653_v63 = vmul.f32 %v2883_v2, %v574_v51  ;;  %969 = vmatprep.mubr.f32.mxu0 %v761_v52  ;;  %v701_v10 = vadd.f32 %v2887_v12, %v625_v23  ;;  %v762_v2 = vmax.f32 %v698_v1, 0.0  ;;  %v1378_v51 = vld [vmem:[%s3545_s7 + $0x30] sm:$0xff]  ;;  %v1376_v1 = vld [vmem:[%s3545_s7 + $0x20] sm:$0xff] }
  0xc9   : > { %v3135_v6 = vadd.f32 %v2885_v11, %v654_v53  ;;  %v3138_v33 = vadd.f32 %v2887_v12, %v655_v0  ;;  %v782_v39 = vmax.f32 %v3071_v54, 0.0  ;;  %v785_v38 = vmax.f32 %v3102_v26, 0.0  ;;  %v1377_v0 = vld [vmem:[%s3545_s7 + $0x28] sm:$0xff] }
  0xca   : > { %v3141_v7 = vadd.f32 %v2885_v11, %v652_v13  ;;  %v3144_v8 = vadd.f32 %v2887_v12, %v653_v63  ;;  %v765_v15 = vmax.f32 %v701_v10, 0.0  ;;  %v1095_v11 = vld [vmem:[%s3543_s5 + $0x18] sm:$0xff]  ;;  %v766_v12 = vmax.f32 %v2986_v41, 0.0  ;;  %v1092_v41 = vld [vmem:[%s3543_s5] sm:$0xff] }
  0xcb   : > { %970 = vmatmul.mubr.f32.gmra.mxu0 %v760_v3  ;;  %2452 = vmatprep.subr.mxu1 %v1095_v11  ;;  %v784_v37 = vmax.f32 %v3099_v25, 0.0  ;;  %v787_v36 = vmax.f32 %v3096_v62, 0.0  ;;  %v786_v61 = vmax.f32 %v3093_v22, 0.0  ;;  %v789_v56 = vmax.f32 %v3124_v48, 0.0 }
  0xcc   : > { %974 = vmatprep.mubr.f32.mxu0 %v763_v9  ;;  %2453 = vmatpush3.msra.mxu1 %v1095_v11  ;;  %v788_v55 = vmax.f32 %v3121_v47, 0.0  ;;  %v791_v54 = vmax.f32 %v3118_v46, 0.0  ;;  %v790_v26 = vmax.f32 %v3115_v45, 0.0  ;;  %v793_v25 = vmax.f32 %v3144_v8, 0.0 }
  0xcd   : > { %2454 = vmatprep.subr.mxu1 %v1094_v27  ;;  %v792_v62 = vmax.f32 %v3141_v7, 0.0  ;;  %v795_v22 = vmax.f32 %v3138_v33, 0.0  ;;  %v794_v34 = vmax.f32 %v3135_v6, 0.0 }
  0xce   : > { %2455 = vmatpush3.msra.mxu1 %v1094_v27 }
  0xcf   : > { %975 = vmatmul.mubr.f32.gmra.mxu0 %v762_v2  ;;  %2456 = vmatprep.subr.mxu1 %v1093_v42 }
  0xd0   : > { %979 = vmatprep.mubr.f32.mxu0 %v765_v15  ;;  %2457 = vmatpush3.msra.mxu1 %v1093_v42 }
  0xd1   : > { %2458 = vmatprep.subr.mxu1 %v1092_v41 }
  0xd2   : > { %2459 = vmatpush3.msra.mxu1 %v1092_v41 }
  0xd3   : > { %980 = vmatmul.mubr.f32.gmra.mxu0 %v764_v16  ;;  %2508 = vmatprep.subr.mxu1 %v1379_v14 }
  0xd4   : > { %984 = vmatprep.mubr.f32.mxu0 %v767_v17 }
  0xd7   : > { %985 = vmatmul.mubr.f32.gmra.mxu0 %v766_v12 }
  0xd8   : > { %989 = vmatprep.mubr.f32.mxu0 %v769_v28 }
  0xdb   : > { %990 = vmatmul.mubr.f32.gmra.mxu0 %v768_v43 }
  0xdc   : > { %994 = vmatprep.mubr.f32.mxu0 %v771_v24 }
  0xdf   : > { %995 = vmatmul.mubr.f32.gmra.mxu0 %v770_v60 }
  0xe0   : > { %999 = vmatprep.mubr.f32.mxu0 %v773_v29 }
  0xe3   : > { %1000 = vmatmul.mubr.f32.gmra.mxu0 %v772_v30 }
  0xe4   : > { %1004 = vmatprep.mubr.f32.mxu0 %v775_v59 }
  0xe7   : > { %1005 = vmatmul.mubr.f32.gmra.mxu0 %v774_v31 }
  0xe8   : > { %1009 = vmatprep.mubr.f32.mxu0 %v777_v58 }
  0xeb   : > { %1010 = vmatmul.mubr.f32.gmra.mxu0 %v776_v32 }
  0xec   : > { %1014 = vmatprep.mubr.f32.mxu0 %v779_v57 }
  0xef   : > { %1015 = vmatmul.mubr.f32.gmra.mxu0 %v778_v21 }
  0xf0   : > { %1019 = vmatprep.mubr.f32.mxu0 %v781_v20 }
  0xf3   : > { %1020 = vmatmul.mubr.f32.gmra.mxu0 %v780_v19 }
  0xf4   : > { %1024 = vmatprep.mubr.f32.mxu0 %v783_v18 }
  0xf7   : > { %1025 = vmatmul.mubr.f32.gmra.mxu0 %v782_v39 }
  0xf8   : > { %1029 = vmatprep.mubr.f32.mxu0 %v785_v38 }
  0xfb   : > { %1030 = vmatmul.mubr.f32.gmra.mxu0 %v784_v37 }
  0xfc   : > { %1034 = vmatprep.mubr.f32.mxu0 %v787_v36 }
  0xff   : > { %1035 = vmatmul.mubr.f32.gmra.mxu0 %v786_v61 }
 0x100   : > { %1039 = vmatprep.mubr.f32.mxu0 %v789_v56 }
 0x103   : > { %1040 = vmatmul.mubr.f32.gmra.mxu0 %v788_v55 }
 0x104   : > { %1044 = vmatprep.mubr.f32.mxu0 %v791_v54 }
 0x107   : > { %1045 = vmatmul.mubr.f32.gmra.mxu0 %v790_v26 }
 0x108   : > { %1049 = vmatprep.mubr.f32.mxu0 %v793_v25 }
 0x10b   : > { %1050 = vmatmul.mubr.f32.gmra.mxu0 %v792_v62 }
 0x10c   : > { %1054 = vmatprep.mubr.f32.mxu0 %v795_v22 }
 0x10f   : > { %1055 = vmatmul.mubr.f32.gmra.mxu0 %v794_v34 }
 0x153   : > { %v901_v40 = vpop.f32.mrf.mxu0 }
 0x154   : > { %v902_v44 = vadd.f32 %v3193_v35, %v901_v40 }
 0x155   : > { %v903_v45 = vpop.f32.mrf.mxu0 }
 0x156   : > { %v1060_v46 = vmax.f32 %v902_v44, 0.0 }
 0x157   : > { %v906_v47 = vpop.f32.mrf.mxu0 }
 0x158   : > { %v907_v48 = vadd.f32 %v3193_v35, %v906_v47  ;;  %2460 = vmatprep.mubr.f32.mxu1 %v1060_v46 }
 0x159   : > { %v908_v49 = vpop.f32.mrf.mxu0 }
 0x15a   : > { %v1061_v23 = vmax.f32 %v907_v48, 0.0 }
 0x15b   : > { %v911_v50 = vpop.f32.mrf.mxu0 }
 0x15c   : > { %v912_v52 = vadd.f32 %v3193_v35, %v911_v50  ;;  %2461 = vmatmul.mubr.f32.vlgmr.msra.gmra.mxu1 %v1061_v23 }
 0x15d   : > { %v913_v53 = vpop.f32.mrf.mxu0  ;;  %2509 = vmatpush3.msra.mxu1 %v1379_v14 }
 0x15e   : > { %v1062_v13 = vmax.f32 %v912_v52, 0.0  ;;  %2510 = vmatprep.subr.mxu1 %v1378_v51 }
 0x15f   : > { %v916_v63 = vpop.f32.mrf.mxu0  ;;  %2511 = vmatpush3.msra.mxu1 %v1378_v51 }
 0x160   : > { %v917_v3 = vadd.f32 %v3193_v35, %v916_v63  ;;  %2463 = vmatprep.mubr.f32.mxu1 %v1062_v13  ;;  %2512 = vmatprep.subr.mxu1 %v1377_v0 }
 0x161   : > { %v918_v6 = vpop.f32.mrf.mxu0  ;;  %2513 = vmatpush3.msra.mxu1 %v1377_v0 }
 0x162   : > { %v1063_v33 = vmax.f32 %v917_v3, 0.0  ;;  %2514 = vmatprep.subr.mxu1 %v1376_v1 }
 0x163   : > { %v921_v7 = vpop.f32.mrf.mxu0  ;;  %2515 = vmatpush3.msra.mxu1 %v1376_v1  ;;  %v1375_v1 = vld [vmem:[%s3545_s7 + $0x18] sm:$0xff] }
 0x164   : > { %v922_v8 = vadd.f32 %v3193_v35, %v921_v7  ;;  %2464 = vmatmul.mubr.f32.gmra.mxu1 %v1063_v33  ;;  %2516 = vmatprep.subr.mxu1 %v1375_v1  ;;  %v1374_v33 = vld [vmem:[%s3545_s7 + $0x10] sm:$0xff] }
 0x165   : > { %v923_v10 = vpop.f32.mrf.mxu0  ;;  %2517 = vmatpush3.msra.mxu1 %v1375_v1 }
 0x166   : > { %v1064_v9 = vmax.f32 %v922_v8, 0.0  ;;  %2518 = vmatprep.subr.mxu1 %v1374_v33  ;;  %v1373_v10 = vld [vmem:[%s3545_s7 + $0x8] sm:$0xff] }
 0x167   : > { %v926_v2 = vpop.f32.mrf.mxu0  ;;  %2519 = vmatpush3.msra.mxu1 %v1374_v33 }
 0x168   : > { %v927_v15 = vadd.f32 %v3193_v35, %v926_v2  ;;  %2466 = vmatprep.mubr.f32.mxu1 %v1064_v9  ;;  %2520 = vmatprep.subr.mxu1 %v1373_v10 }
 0x169   : > { %v928_v16 = vpop.f32.mrf.mxu0  ;;  %2521 = vmatpush3.msra.mxu1 %v1373_v10 }
 0x16a   : > { %v1065_v17 = vmax.f32 %v927_v15, 0.0  ;;  %v1372_v15 = vld [vmem:[%s3545_s7] sm:$0xff] }
 0x16b   : > { %v931_v11 = vpop.f32.mrf.mxu0  ;;  %2522 = vmatprep.subr.mxu1 %v1372_v15 }
 0x16c   : > { %v932_v12 = vadd.f32 %v3193_v35, %v931_v11  ;;  %2467 = vmatmul.mubr.f32.gmra.mxu1 %v1065_v17 }
 0x16d   : > { %v933_v27 = vpop.f32.mrf.mxu0  ;;  %2523 = vmatpush3.msra.mxu1 %v1372_v15 }
 0x16e   : > { %v1066_v28 = vmax.f32 %v932_v12, 0.0 }
 0x16f   : > { %v936_v42 = vpop.f32.mrf.mxu0 }
 0x170   : > { %v937_v43 = vadd.f32 %v3193_v35, %v936_v42  ;;  %2469 = vmatprep.mubr.f32.mxu1 %v1066_v28 }
 0x171   : > { %v938_v41 = vpop.f32.mrf.mxu0 }
 0x172   : > { %v1067_v24 = vmax.f32 %v937_v43, 0.0 }
 0x173   : > { %v941_v60 = vpop.f32.mrf.mxu0 }
 0x174   : > { %v942_v29 = vadd.f32 %v3193_v35, %v941_v60  ;;  %2470 = vmatmul.mubr.f32.gmra.mxu1 %v1067_v24 }
 0x175   : > { %v943_v30 = vpop.f32.mrf.mxu0 }
 0x176   : > { %v1068_v59 = vmax.f32 %v942_v29, 0.0 }
 0x177   : > { %v946_v31 = vpop.f32.mrf.mxu0 }
 0x178   : > { %v947_v58 = vadd.f32 %v3193_v35, %v946_v31  ;;  %2472 = vmatprep.mubr.f32.mxu1 %v1068_v59 }
 0x179   : > { %v948_v32 = vpop.f32.mrf.mxu0 }
 0x17a   : > { %v1069_v57 = vmax.f32 %v947_v58, 0.0 }
 0x17b   : > { %v951_v21 = vpop.f32.mrf.mxu0 }
 0x17c   : > { %v952_v20 = vadd.f32 %v3193_v35, %v951_v21  ;;  %2473 = vmatmul.mubr.f32.gmra.mxu1 %v1069_v57 }
 0x17d   : > { %v953_v19 = vpop.f32.mrf.mxu0 }
 0x17e   : > { %v1070_v18 = vmax.f32 %v952_v20, 0.0 }
 0x17f   : > { %v956_v39 = vpop.f32.mrf.mxu0 }
 0x180   : > { %v957_v38 = vadd.f32 %v3193_v35, %v956_v39  ;;  %2475 = vmatprep.mubr.f32.mxu1 %v1070_v18 }
 0x181   : > { %v958_v37 = vpop.f32.mrf.mxu0 }
 0x182   : > { %v1071_v36 = vmax.f32 %v957_v38, 0.0 }
 0x183   : > { %v961_v61 = vpop.f32.mrf.mxu0 }
 0x184   : > { %v962_v56 = vadd.f32 %v3193_v35, %v961_v61  ;;  %2476 = vmatmul.mubr.f32.gmra.mxu1 %v1071_v36 }
 0x185   : > { %v963_v55 = vpop.f32.mrf.mxu0 }
 0x186   : > { %v1072_v54 = vmax.f32 %v962_v56, 0.0 }
 0x187   : > { %v966_v26 = vpop.f32.mrf.mxu0 }
 0x188   : > { %v967_v25 = vadd.f32 %v3193_v35, %v966_v26  ;;  %2478 = vmatprep.mubr.f32.mxu1 %v1072_v54 }
 0x189   : > { %v968_v62 = vpop.f32.mrf.mxu0 }
 0x18a   : > { %v1073_v22 = vmax.f32 %v967_v25, 0.0 }
 0x18b   : > { %v971_v34 = vpop.f32.mrf.mxu0 }
 0x18c   : > { %v972_v40 = vadd.f32 %v3193_v35, %v971_v34  ;;  %2479 = vmatmul.mubr.f32.gmra.mxu1 %v1073_v22 }
 0x18d   : > { %v973_v44 = vpop.f32.mrf.mxu0 }
 0x18e   : > { %v1074_v14 = vmax.f32 %v972_v40, 0.0 }
 0x18f   : > { %v976_v45 = vpop.f32.mrf.mxu0 }
 0x190   : > { %v977_v46 = vadd.f32 %v3193_v35, %v976_v45  ;;  %2481 = vmatprep.mubr.f32.mxu1 %v1074_v14 }
 0x191   : > { %v978_v47 = vpop.f32.mrf.mxu0 }
 0x192   : > { %v1075_v48 = vmax.f32 %v977_v46, 0.0 }
 0x193   : > { %v981_v49 = vpop.f32.mrf.mxu0 }
 0x194   : > { %v982_v23 = vadd.f32 %v3193_v35, %v981_v49  ;;  %2482 = vmatmul.mubr.f32.gmra.mxu1 %v1075_v48 }
 0x195   : > { %v983_v50 = vpop.f32.mrf.mxu0 }
 0x196   : > { %v1076_v51 = vmax.f32 %v982_v23, 0.0 }
 0x197   : > { %v986_v52 = vpop.f32.mrf.mxu0 }
 0x198   : > { %v987_v53 = vadd.f32 %v3193_v35, %v986_v52  ;;  %2484 = vmatprep.mubr.f32.mxu1 %v1076_v51 }
 0x199   : > { %v988_v0 = vpop.f32.mrf.mxu0 }
 0x19a   : > { %v1077_v13 = vmax.f32 %v987_v53, 0.0 }
 0x19b   : > { %v991_v63 = vpop.f32.mrf.mxu0 }
 0x19c   : > { %v992_v3 = vadd.f32 %v3193_v35, %v991_v63  ;;  %2485 = vmatmul.mubr.f32.gmra.mxu1 %v1077_v13  ;;  %v3254_v13 = vld [vmem:[%s3544_s6] ss:$0 sm:$0xff] }
 0x19d   : > { %v993_v6 = vpop.f32.mrf.mxu0 }
 0x19e   : > { %v1078_v7 = vmax.f32 %v992_v3, 0.0 }
 0x19f   : > { %v996_v8 = vpop.f32.mrf.mxu0 }
 0x1a0   : > { %v997_v9 = vadd.f32 %v3193_v35, %v996_v8  ;;  %2487 = vmatprep.mubr.f32.mxu1 %v1078_v7 }
 0x1a1   : > { %v998_v2 = vpop.f32.mrf.mxu0 }
 0x1a2   : > { %v1079_v16 = vmax.f32 %v997_v9, 0.0 }
 0x1a3   : > { %v1001_v17 = vpop.f32.mrf.mxu0 }
 0x1a4   : > { %v1002_v11 = vadd.f32 %v3193_v35, %v1001_v17  ;;  %2488 = vmatmul.mubr.f32.gmra.mxu1 %v1079_v16 }
 0x1a5   : > { %v1003_v12 = vpop.f32.mrf.mxu0 }
 0x1a6   : > { %v1080_v27 = vmax.f32 %v1002_v11, 0.0 }
 0x1a7   : > { %v1006_v28 = vpop.f32.mrf.mxu0 }
 0x1a8   : > { %v1007_v42 = vadd.f32 %v3193_v35, %v1006_v28  ;;  %2490 = vmatprep.mubr.f32.mxu1 %v1080_v27 }
 0x1a9   : > { %v1008_v43 = vpop.f32.mrf.mxu0 }
 0x1aa   : > { %v1081_v41 = vmax.f32 %v1007_v42, 0.0 }
 0x1ab   : > { %v1011_v24 = vpop.f32.mrf.mxu0 }
 0x1ac   : > { %v1012_v60 = vadd.f32 %v3193_v35, %v1011_v24  ;;  %2491 = vmatmul.mubr.f32.gmra.mxu1 %v1081_v41 }
 0x1ad   : > { %v1013_v29 = vpop.f32.mrf.mxu0 }
 0x1ae   : > { %v1082_v30 = vmax.f32 %v1012_v60, 0.0 }
 0x1af   : > { %v1016_v59 = vpop.f32.mrf.mxu0 }
 0x1b0   : > { %v1017_v31 = vadd.f32 %v3193_v35, %v1016_v59  ;;  %2493 = vmatprep.mubr.f32.mxu1 %v1082_v30 }
 0x1b1   : > { %v1018_v58 = vpop.f32.mrf.mxu0 }
 0x1b2   : > { %v1083_v32 = vmax.f32 %v1017_v31, 0.0 }
 0x1b3   : > { %v1021_v57 = vpop.f32.mrf.mxu0 }
 0x1b4   : > { %v1022_v21 = vadd.f32 %v3193_v35, %v1021_v57  ;;  %2494 = vmatmul.mubr.f32.gmra.mxu1 %v1083_v32 }
 0x1b5   : > { %v1023_v20 = vpop.f32.mrf.mxu0 }
 0x1b6   : > { %v1084_v19 = vmax.f32 %v1022_v21, 0.0 }
 0x1b7   : > { %v1026_v18 = vpop.f32.mrf.mxu0 }
 0x1b8   : > { %v1027_v39 = vadd.f32 %v3193_v35, %v1026_v18  ;;  %2496 = vmatprep.mubr.f32.mxu1 %v1084_v19 }
 0x1b9   : > { %v1028_v38 = vpop.f32.mrf.mxu0 }
 0x1ba   : > { %v1085_v37 = vmax.f32 %v1027_v39, 0.0 }
 0x1bb   : > { %v1031_v36 = vpop.f32.mrf.mxu0 }
 0x1bc   : > { %v1032_v61 = vadd.f32 %v3193_v35, %v1031_v36  ;;  %2497 = vmatmul.mubr.f32.gmra.mxu1 %v1085_v37 }
 0x1bd   : > { %v1033_v56 = vpop.f32.mrf.mxu0 }
 0x1be   : > { %v1086_v55 = vmax.f32 %v1032_v61, 0.0 }
 0x1bf   : > { %v1036_v54 = vpop.f32.mrf.mxu0 }
 0x1c0   : > { %v1037_v26 = vadd.f32 %v3193_v35, %v1036_v54  ;;  %2499 = vmatprep.mubr.f32.mxu1 %v1086_v55 }
 0x1c1   : > { %v1038_v25 = vpop.f32.mrf.mxu0 }
 0x1c2   : > { %v1087_v62 = vmax.f32 %v1037_v26, 0.0 }
 0x1c3   : > { %v1041_v22 = vpop.f32.mrf.mxu0 }
 0x1c4   : > { %v1042_v34 = vadd.f32 %v3193_v35, %v1041_v22  ;;  %2500 = vmatmul.mubr.f32.gmra.mxu1 %v1087_v62 }
 0x1c5   : > { %v1043_v40 = vpop.f32.mrf.mxu0 }
 0x1c6   : > { %v1088_v44 = vmax.f32 %v1042_v34, 0.0 }
 0x1c7   : > { %v1046_v14 = vpop.f32.mrf.mxu0 }
 0x1c8   : > { %v1047_v45 = vadd.f32 %v3193_v35, %v1046_v14  ;;  %2502 = vmatprep.mubr.f32.mxu1 %v1088_v44 }
 0x1c9   : > { %v1048_v46 = vpop.f32.mrf.mxu0 }
 0x1ca   : > { %v1089_v47 = vmax.f32 %v1047_v45, 0.0 }
 0x1cb   : > { %v1051_v48 = vpop.f32.mrf.mxu0 }
 0x1cc   : > { %v1052_v49 = vadd.f32 %v3193_v35, %v1051_v48  ;;  %2503 = vmatmul.mubr.f32.gmra.mxu1 %v1089_v47 }
 0x1cd   : > { %v1053_v23 = vpop.f32.mrf.mxu0 }
 0x1ce   : > { %v1090_v50 = vmax.f32 %v1052_v49, 0.0 }
 0x1cf   : > { %v1056_v51 = vpop.f32.mrf.mxu0 }
 0x1d0   : > { %v1057_v52 = vadd.f32 %v3193_v35, %v1056_v51  ;;  %2505 = vmatprep.mubr.f32.mxu1 %v1090_v50 }
 0x1d1   : > { %v1058_v53 = vpop.f32.mrf.mxu0 }
 0x1d2   : > { %v1091_v0 = vmax.f32 %v1057_v52, 0.0 }
 0x1d4   : > { %2506 = vmatmul.mubr.f32.gmra.mxu1 %v1091_v0 }
 0x21c   : > { %v2462_v63 = vpop.f32.mrf.mxu1 }
 0x21d   : > { %v1187_v1 = vadd.f32 %v2462_v63, %v3254_v13 }
 0x21e   : > { %v1181_v3 = vpop.f32.mrf.mxu1 }
 0x21f   : > { %v1182_v6 = vadd.f32 %v3254_v13, %v1181_v3  ;;  %v1341_v7 = vmax.f32 %v1187_v1, 0.0 }
 0x221   : > { %v1340_v33 = vmax.f32 %v1182_v6, 0.0 }
 0x223   : > { %2524 = vmatprep.mubr.msk.f32.mxu1 %vm1387_vm0, %v1340_v33 }
 0x224   : > { %v2465_v35 = vpop.f32.mrf.mxu1  ;;  %2525 = vmatmul.mubr.msk.f32.vlgmr.msra.gmra.mxu1 %vm1387_vm0, %v1341_v7 }
 0x225   : > { %v1197_v8 = vadd.f32 %v2465_v35, %v3254_v13 }
 0x226   : > { %v1191_v10 = vpop.f32.mrf.mxu1 }
 0x227   : > { %v1192_v9 = vadd.f32 %v3254_v13, %v1191_v10  ;;  %v1343_v15 = vmax.f32 %v1197_v8, 0.0 }
 0x229   : > { %v1342_v2 = vmax.f32 %v1192_v9, 0.0 }
 0x22b   : > { %2527 = vmatprep.mubr.msk.f32.mxu1 %vm1387_vm0, %v1342_v2 }
 0x22c   : > { %v2468_v16 = vpop.f32.mrf.mxu1  ;;  %2528 = vmatmul.mubr.msk.f32.gmra.mxu1 %vm1387_vm0, %v1343_v15 }
 0x22d   : > { %v1207_v17 = vadd.f32 %v2468_v16, %v3254_v13 }
 0x22e   : > { %v1201_v11 = vpop.f32.mrf.mxu1 }
 0x22f   : > { %v1202_v12 = vadd.f32 %v3254_v13, %v1201_v11  ;;  %v1345_v28 = vmax.f32 %v1207_v17, 0.0 }
 0x231   : > { %v1344_v27 = vmax.f32 %v1202_v12, 0.0 }
 0x233   : > { %2530 = vmatprep.mubr.msk.f32.mxu1 %vm1387_vm0, %v1344_v27 }
 0x234   : > { %v2471_v42 = vpop.f32.mrf.mxu1  ;;  %2531 = vmatmul.mubr.msk.f32.gmra.mxu1 %vm1387_vm0, %v1345_v28 }
 0x235   : > { %v1217_v43 = vadd.f32 %v2471_v42, %v3254_v13 }
 0x236   : > { %v1211_v41 = vpop.f32.mrf.mxu1 }
 0x237   : > { %v1212_v24 = vadd.f32 %v3254_v13, %v1211_v41  ;;  %v1347_v29 = vmax.f32 %v1217_v43, 0.0 }
 0x239   : > { %v1346_v60 = vmax.f32 %v1212_v24, 0.0 }
 0x23b   : > { %2533 = vmatprep.mubr.msk.f32.mxu1 %vm1387_vm0, %v1346_v60 }
 0x23c   : > { %v2474_v30 = vpop.f32.mrf.mxu1  ;;  %2534 = vmatmul.mubr.msk.f32.gmra.mxu1 %vm1387_vm0, %v1347_v29 }
 0x23d   : > { %v1227_v59 = vadd.f32 %v2474_v30, %v3254_v13 }
 0x23e   : > { %v1221_v31 = vpop.f32.mrf.mxu1 }
 0x23f   : > { %v1222_v58 = vadd.f32 %v3254_v13, %v1221_v31  ;;  %v1349_v57 = vmax.f32 %v1227_v59, 0.0 }
 0x241   : > { %v1348_v32 = vmax.f32 %v1222_v58, 0.0 }
 0x243   : > { %2536 = vmatprep.mubr.msk.f32.mxu1 %vm1387_vm0, %v1348_v32 }
 0x244   : > { %v2477_v21 = vpop.f32.mrf.mxu1  ;;  %2537 = vmatmul.mubr.msk.f32.gmra.mxu1 %vm1387_vm0, %v1349_v57 }
 0x245   : > { %v1237_v20 = vadd.f32 %v2477_v21, %v3254_v13 }
 0x246   : > { %v1231_v19 = vpop.f32.mrf.mxu1 }
 0x247   : > { %v1232_v18 = vadd.f32 %v3254_v13, %v1231_v19  ;;  %v1351_v38 = vmax.f32 %v1237_v20, 0.0 }
 0x249   : > { %v1350_v39 = vmax.f32 %v1232_v18, 0.0 }
 0x24b   : > { %2539 = vmatprep.mubr.msk.f32.mxu1 %vm1387_vm0, %v1350_v39 }
 0x24c   : > { %v2480_v37 = vpop.f32.mrf.mxu1  ;;  %2540 = vmatmul.mubr.msk.f32.gmra.mxu1 %vm1387_vm0, %v1351_v38 }
 0x24d   : > { %v1247_v36 = vadd.f32 %v2480_v37, %v3254_v13 }
 0x24e   : > { %v1241_v61 = vpop.f32.mrf.mxu1 }
 0x24f   : > { %v1242_v56 = vadd.f32 %v3254_v13, %v1241_v61  ;;  %v1353_v54 = vmax.f32 %v1247_v36, 0.0 }
 0x251   : > { %v1352_v55 = vmax.f32 %v1242_v56, 0.0 }
 0x253   : > { %2542 = vmatprep.mubr.msk.f32.mxu1 %vm1387_vm0, %v1352_v55 }
 0x254   : > { %v2483_v26 = vpop.f32.mrf.mxu1  ;;  %2543 = vmatmul.mubr.msk.f32.gmra.mxu1 %vm1387_vm0, %v1353_v54 }
 0x255   : > { %v1257_v25 = vadd.f32 %v2483_v26, %v3254_v13 }
 0x256   : > { %v1251_v62 = vpop.f32.mrf.mxu1 }
 0x257   : > { %v1252_v22 = vadd.f32 %v3254_v13, %v1251_v62  ;;  %v1355_v40 = vmax.f32 %v1257_v25, 0.0  ;;  %v3343_v62 = vld [vmem:[%s3547_s9] sm:$0x3] }
 0x259   : > { %v1354_v34 = vmax.f32 %v1252_v22, 0.0 }
 0x25b   : > { %2545 = vmatprep.mubr.msk.f32.mxu1 %vm1387_vm0, %v1354_v34 }
 0x25c   : > { %v2486_v44 = vpop.f32.mrf.mxu1  ;;  %2546 = vmatmul.mubr.msk.f32.gmra.mxu1 %vm1387_vm0, %v1355_v40 }
 0x25d   : > { %v1267_v14 = vadd.f32 %v2486_v44, %v3254_v13 }
 0x25e   : > { %v1261_v45 = vpop.f32.mrf.mxu1 }
 0x25f   : > { %v1262_v46 = vadd.f32 %v3254_v13, %v1261_v45  ;;  %v1357_v48 = vmax.f32 %v1267_v14, 0.0 }
 0x261   : > { %v1356_v47 = vmax.f32 %v1262_v46, 0.0 }
 0x263   : > { %2548 = vmatprep.mubr.msk.f32.mxu1 %vm1387_vm0, %v1356_v47 }
 0x264   : > { %v2489_v49 = vpop.f32.mrf.mxu1  ;;  %2549 = vmatmul.mubr.msk.f32.gmra.mxu1 %vm1387_vm0, %v1357_v48 }
 0x265   : > { %v1277_v23 = vadd.f32 %v2489_v49, %v3254_v13 }
 0x266   : > { %v1271_v50 = vpop.f32.mrf.mxu1 }
 0x267   : > { %v1272_v51 = vadd.f32 %v3254_v13, %v1271_v50  ;;  %v1359_v53 = vmax.f32 %v1277_v23, 0.0 }
 0x269   : > { %v1358_v52 = vmax.f32 %v1272_v51, 0.0 }
 0x26b   : > { %2551 = vmatprep.mubr.msk.f32.mxu1 %vm1387_vm0, %v1358_v52 }
 0x26c   : > { %v2492_v0 = vpop.f32.mrf.mxu1  ;;  %2552 = vmatmul.mubr.msk.f32.gmra.mxu1 %vm1387_vm0, %v1359_v53 }
 0x26d   : > { %v1287_v63 = vadd.f32 %v2492_v0, %v3254_v13 }
 0x26e   : > { %v1281_v1 = vpop.f32.mrf.mxu1 }
 0x26f   : > { %v1282_v3 = vadd.f32 %v3254_v13, %v1281_v1  ;;  %v1361_v33 = vmax.f32 %v1287_v63, 0.0 }
 0x271   : > { %v1360_v6 = vmax.f32 %v1282_v3, 0.0 }
 0x273   : > { %2554 = vmatprep.mubr.msk.f32.mxu1 %vm1387_vm0, %v1360_v6 }
 0x274   : > { %v2495_v7 = vpop.f32.mrf.mxu1  ;;  %2555 = vmatmul.mubr.msk.f32.gmra.mxu1 %vm1387_vm0, %v1361_v33  ;;  %v3362_v33 = vld [vmem:[%s3546_s8] ss:$0 sm:$0xff] }
 0x275   : > { %v1297_v35 = vadd.f32 %v2495_v7, %v3254_v13 }
 0x276   : > { %v1291_v8 = vpop.f32.mrf.mxu1 }
 0x277   : > { %v1292_v10 = vadd.f32 %v3254_v13, %v1291_v8  ;;  %v1363_v2 = vmax.f32 %v1297_v35, 0.0 }
 0x279   : > { %v1362_v9 = vmax.f32 %v1292_v10, 0.0 }
 0x27b   : > { %2557 = vmatprep.mubr.msk.f32.mxu1 %vm1387_vm0, %v1362_v9 }
 0x27c   : > { %v2498_v15 = vpop.f32.mrf.mxu1  ;;  %2558 = vmatmul.mubr.msk.f32.gmra.mxu1 %vm1387_vm0, %v1363_v2 }
 0x27d   : > { %v1307_v16 = vadd.f32 %v2498_v15, %v3254_v13 }
 0x27e   : > { %v1301_v17 = vpop.f32.mrf.mxu1 }
 0x27f   : > { %v1302_v11 = vadd.f32 %v3254_v13, %v1301_v17  ;;  %v1365_v27 = vmax.f32 %v1307_v16, 0.0 }
 0x281   : > { %v1364_v12 = vmax.f32 %v1302_v11, 0.0 }
 0x283   : > { %2560 = vmatprep.mubr.msk.f32.mxu1 %vm1387_vm0, %v1364_v12 }
 0x284   : > { %v2501_v28 = vpop.f32.mrf.mxu1  ;;  %2561 = vmatmul.mubr.msk.f32.gmra.mxu1 %vm1387_vm0, %v1365_v27 }
 0x285   : > { %v1317_v42 = vadd.f32 %v2501_v28, %v3254_v13 }
 0x286   : > { %v1311_v43 = vpop.f32.mrf.mxu1 }
 0x287   : > { %v1312_v41 = vadd.f32 %v3254_v13, %v1311_v43  ;;  %v1367_v60 = vmax.f32 %v1317_v42, 0.0 }
 0x289   : > { %v1366_v24 = vmax.f32 %v1312_v41, 0.0 }
 0x28b   : > { %2563 = vmatprep.mubr.msk.f32.mxu1 %vm1387_vm0, %v1366_v24 }
 0x28c   : > { %v2504_v29 = vpop.f32.mrf.mxu1  ;;  %2564 = vmatmul.mubr.msk.f32.gmra.mxu1 %vm1387_vm0, %v1367_v60 }
 0x28d   : > { %v1327_v30 = vadd.f32 %v2504_v29, %v3254_v13 }
 0x28e   : > { %v1321_v59 = vpop.f32.mrf.mxu1 }
 0x28f   : > { %v1322_v31 = vadd.f32 %v3254_v13, %v1321_v59  ;;  %v1369_v32 = vmax.f32 %v1327_v30, 0.0 }
 0x291   : > { %v1368_v58 = vmax.f32 %v1322_v31, 0.0 }
 0x293   : > { %2566 = vmatprep.mubr.msk.f32.mxu1 %vm1387_vm0, %v1368_v58 }
 0x294   : > { %v2507_v57 = vpop.f32.mrf.mxu1  ;;  %2567 = vmatmul.mubr.msk.f32.gmra.mxu1 %vm1387_vm0, %v1369_v32 }
 0x295   : > { %v1337_v21 = vadd.f32 %v2507_v57, %v3254_v13 }
 0x296   : > { %v1331_v20 = vpop.f32.mrf.mxu1 }
 0x297   : > { %v1332_v19 = vadd.f32 %v3254_v13, %v1331_v20  ;;  %v1371_v39 = vmax.f32 %v1337_v21, 0.0 }
 0x299   : > { %v1370_v18 = vmax.f32 %v1332_v19, 0.0 }
 0x29b   : > { %2569 = vmatprep.mubr.msk.f32.mxu1 %vm1387_vm0, %v1370_v18 }
 0x29c   : > { %2570 = vmatmul.mubr.msk.f32.gmra.mxu1 %vm1387_vm0, %v1371_v39 }
 0x29d   : > { %2426 = vmatprep.mubr.msk.f32.mxu1 %vm1748_vm1, %v3343_v62 }
 0x2e4   : > { %v3320_v38 = vpop.f32.mrf.mxu1 }
 0x2e6   : > { %v3322_v37 = vpop.f32.mrf.mxu1 }
 0x2ec   : > { %v3324_v36 = vpop.f32.mrf.mxu1 }
 0x2ee   : > { %v3326_v61 = vpop.f32.mrf.mxu1 }
 0x2f4   : > { %v3328_v56 = vpop.f32.mrf.mxu1 }
 0x2f6   : > { %v3330_v55 = vpop.f32.mrf.mxu1 }
 0x2fc   : > { %v3332_v54 = vpop.f32.mrf.mxu1 }
 0x2fe   : > { %v3334_v13 = vpop.f32.mrf.mxu1 }
 0x304   : > { %v3336_v26 = vpop.f32.mrf.mxu1 }
 0x305   : > { %v1596_v20 = vadd.f32 %v3336_v26, %v3362_v33  ;;  %v1586_v26 = vadd.f32 %v3332_v54, %v3362_v33  ;;  %v1576_v54 = vadd.f32 %v3328_v56, %v3362_v33  ;;  %v1566_v56 = vadd.f32 %v3324_v36, %v3362_v33 }
 0x306   : > { %v3338_v25 = vpop.f32.mrf.mxu1  ;;  %v1556_v36 = vadd.f32 %v3320_v38, %v3362_v33  ;;  %v1746_v38 = vpop.permute.xlu0 %1745 }
 0x30c   : > { %v2541_v22 = vpop.f32.mrf.mxu1 }
 0x30d   : > { %v1606_v29 = vadd.f32 %v2541_v22, %v3362_v33  ;;  %v1718_v22 = vmax.f32 %v1596_v20, 0.0 }
 0x30e   : > { %v1600_v34 = vpop.f32.mrf.mxu1 }
 0x30f   : > { %v1720_v58 = vmax.f32 %v1606_v29, 0.0  ;;  %v1601_v32 = vadd.f32 %v3362_v33, %v1600_v34  ;;  %v1591_v34 = vadd.f32 %v3362_v33, %v3338_v25  ;;  %v1581_v25 = vadd.f32 %v3362_v33, %v3334_v13 }
 0x310   : > { %v1714_v13 = vmax.f32 %v1576_v54, 0.0 }
 0x311   : > { %v1719_v19 = vmax.f32 %v1601_v32, 0.0 }
 0x314   : > { %v2544_v40 = vpop.f32.mrf.mxu1 }
 0x315   : > { %v1616_v12 = vadd.f32 %v2544_v40, %v3362_v33 }
 0x316   : > { %v1610_v44 = vpop.f32.mrf.mxu1 }
 0x317   : > { %v1722_v43 = vmax.f32 %v1616_v12, 0.0  ;;  %v1611_v41 = vadd.f32 %v3362_v33, %v1610_v44 }
 0x319   : > { %v1721_v30 = vmax.f32 %v1611_v41, 0.0 }
 0x31c   : > { %v2547_v14 = vpop.f32.mrf.mxu1 }
 0x31d   : > { %v1626_v7 = vadd.f32 %v2547_v14, %v3362_v33  ;;  %v1717_v14 = vmax.f32 %v1591_v34, 0.0 }
 0x31e   : > { %v1620_v45 = vpop.f32.mrf.mxu1 }
 0x31f   : > { %v1724_v15 = vmax.f32 %v1626_v7, 0.0  ;;  %v1621_v16 = vadd.f32 %v3362_v33, %v1620_v45 }
 0x321   : > { %v1723_v27 = vmax.f32 %v1621_v16, 0.0 }
 0x324   : > { %v3347_v46 = vpop.f32.mrf.mxu1 }
 0x326   : > { %v3349_v47 = vpop.f32.mrf.mxu1 }
 0x32c   : > { %v3351_v48 = vpop.f32.mrf.mxu1 }
 0x32e   : > { %v3353_v49 = vpop.f32.mrf.mxu1 }
 0x334   : > { %v3355_v23 = vpop.f32.mrf.mxu1 }
 0x336   : > { %v3357_v50 = vpop.f32.mrf.mxu1 }
 0x33c   : > { %v2559_v51 = vpop.f32.mrf.mxu1 }
 0x33d   : > { %v1666_v40 = vadd.f32 %v2559_v51, %v3362_v33  ;;  %v1656_v51 = vadd.f32 %v3355_v23, %v3362_v33  ;;  %v1571_v23 = vadd.f32 %v3362_v33, %v3330_v55  ;;  %v1712_v55 = vmax.f32 %v1566_v56, 0.0 }
 0x33e   : > { %v1660_v52 = vpop.f32.mrf.mxu1 }
 0x33f   : > { %v1732_v45 = vmax.f32 %v1666_v40, 0.0  ;;  %v2626_v40 = vmov 2475754826  }
 0x344   : > { %v2562_v53 = vpop.f32.mrf.mxu1 }
 0x345   : > { %v1676_v57 = vadd.f32 %v2562_v53, %v3362_v33  ;;  %v1661_v53 = vadd.f32 %v3362_v33, %v1660_v52  ;;  %v1715_v52 = vmax.f32 %v1581_v25, 0.0 }
 0x346   : > { %v1670_v0 = vpop.f32.mrf.mxu1 }
 0x347   : > { %v1734_v18 = vmax.f32 %v1676_v57, 0.0  ;;  %v1671_v39 = vadd.f32 %v3362_v33, %v1670_v0  ;;  %v1716_v0 = vmax.f32 %v1586_v26, 0.0  ;;  %v2627_v26 = vmov 2131351028  }
 0x349   : > { %v1733_v44 = vmax.f32 %v1671_v39, 0.0  ;;  %v2625_v39 = vmov 683565275  }
 0x34c   : > { %v2565_v63 = vpop.f32.mrf.mxu1 }
 0x34d   : > { %v1686_v24 = vadd.f32 %v2565_v63, %v3362_v33  ;;  %v1731_v63 = vmax.f32 %v1661_v53, 0.0 }
 0x34e   : > { %v1680_v1 = vpop.f32.mrf.mxu1 }
 0x34f   : > { %v1736_v59 = vmax.f32 %v1686_v24, 0.0  ;;  %v1681_v31 = vadd.f32 %v3362_v33, %v1680_v1  ;;  %v1730_v1 = vmax.f32 %v1656_v51, 0.0 }
 0x351   : > { %v1735_v21 = vmax.f32 %v1681_v31, 0.0 }
 0x354   : > { %v2568_v3 = vpop.f32.mrf.mxu1 }
 0x355   : > { %v1696_v17 = vadd.f32 %v2568_v3, %v3362_v33  ;;  %v1651_v3 = vadd.f32 %v3362_v33, %v3357_v50  ;;  %v1713_v50 = vmax.f32 %v1571_v23, 0.0 }
 0x356   : > { %v1690_v6 = vpop.f32.mrf.mxu1 }
 0x357   : > { %v1738_v28 = vmax.f32 %v1696_v17, 0.0  ;;  %v1691_v42 = vadd.f32 %v3362_v33, %v1690_v6  ;;  %v1646_v6 = vadd.f32 %v3351_v48, %v3362_v33  ;;  %v1729_v7 = vmax.f32 %v1651_v3, 0.0 }
 0x358   : > { %v1561_v48 = vadd.f32 %v3362_v33, %v3326_v61  ;;  %v1710_v61 = vmax.f32 %v1556_v36, 0.0  ;;  %v2630_v3 = vmov 1326507024  }
 0x359   : > { %v1737_v60 = vmax.f32 %v1691_v42, 0.0 }
 0x35c   : > { %v2571_v35 = vpop.f32.mrf.mxu1 }
 0x35d   : > { %v1706_v8 = vadd.f32 %v2571_v35, %v3362_v33  ;;  %v1728_v35 = vmax.f32 %v1646_v6, 0.0 }
 0x35e   : > { %v1700_v10 = vpop.f32.mrf.mxu1 }
 0x35f   : > { %v1740_v9 = vmax.f32 %v1706_v8, 0.0  ;;  %v1701_v2 = vadd.f32 %v3362_v33, %v1700_v10  ;;  %v1641_v8 = vadd.f32 %v3362_v33, %v3353_v49  ;;  %v1636_v10 = vadd.f32 %v3347_v46, %v3362_v33 }
 0x360   : > { %v1711_v49 = vmax.f32 %v1561_v48, 0.0  ;;  %v1551_v46 = vadd.f32 %v3362_v33, %v3322_v37 }
 0x361   : > { %v1739_v11 = vmax.f32 %v1701_v2, 0.0  ;;  %2394 = vmatprep.subr.msk.mxu1 %vm1748_vm1, %v1740_v9  ;;  %v1727_v9 = vmax.f32 %v1641_v8, 0.0  ;;  %v1726_v2 = vmax.f32 %v1636_v10, 0.0 }
 0x362   : > { %2395 = vmatpush3.xpose.msk.msra.mxu1 %vm1748_vm1, %v1724_v15  ;;  %v1631_v15 = vadd.f32 %v3362_v33, %v3349_v47  ;;  %v1709_v17 = vmax.f32 %v1551_v46, 0.0 }
 0x363   : > { %2396 = vmatprep.subr.msk.mxu1 %vm1748_vm1, %v1739_v11 }
 0x364   : > { %v1725_v16 = vmax.f32 %v1631_v15, 0.0 }
 0x366   : > { %2397 = vmatpush3.xpose.msk.msra.mxu1 %vm1748_vm1, %v1723_v27 }
 0x367   : > { %2398 = vmatprep.subr.msk.mxu1 %vm1748_vm1, %v1738_v28 }
 0x36a   : > { %2399 = vmatpush3.xpose.msk.msra.mxu1 %vm1748_vm1, %v1722_v43 }
 0x36b   : > { %2400 = vmatprep.subr.msk.mxu1 %vm1748_vm1, %v1737_v60 }
 0x36e   : > { %2401 = vmatpush3.xpose.msk.msra.mxu1 %vm1748_vm1, %v1721_v30 }
 0x36f   : > { %2402 = vmatprep.subr.msk.mxu1 %vm1748_vm1, %v1736_v59 }
 0x372   : > { %2403 = vmatpush3.xpose.msk.msra.mxu1 %vm1748_vm1, %v1720_v58 }
 0x373   : > { %2404 = vmatprep.subr.msk.mxu1 %vm1748_vm1, %v1735_v21 }
 0x376   : > { %2405 = vmatpush3.xpose.msk.msra.mxu1 %vm1748_vm1, %v1719_v19 }
 0x377   : > { %2406 = vmatprep.subr.msk.mxu1 %vm1748_vm1, %v1734_v18 }
 0x37a   : > { %2407 = vmatpush3.xpose.msk.msra.mxu1 %vm1748_vm1, %v1718_v22 }
 0x37b   : > { %2408 = vmatprep.subr.msk.mxu1 %vm1748_vm1, %v1733_v44 }
 0x37e   : > { %2409 = vmatpush3.xpose.msk.msra.mxu1 %vm1748_vm1, %v1717_v14 }
 0x37f   : > { %2410 = vmatprep.subr.msk.mxu1 %vm1748_vm1, %v1732_v45  ;;  %v2628_v45 = vmov 2102212464  }
 0x382   : > { %2411 = vmatpush3.xpose.msk.msra.mxu1 %vm1748_vm1, %v1716_v0  ;;  %v2629_v0 = vmov 920167782  }
 0x383   : > { %2412 = vmatprep.subr.msk.mxu1 %vm1748_vm1, %v1731_v63 }
 0x386   : > { %2413 = vmatpush3.xpose.msk.msra.mxu1 %vm1748_vm1, %v1715_v52 }
 0x387   : > { %2414 = vmatprep.subr.msk.mxu1 %vm1748_vm1, %v1730_v1 }
 0x38a   : > { %2415 = vmatpush3.xpose.msk.msra.mxu1 %vm1748_vm1, %v1714_v13 }
 0x38b   : > { %2416 = vmatprep.subr.msk.mxu1 %vm1748_vm1, %v1729_v7 }
 0x38e   : > { %2417 = vmatpush3.xpose.msk.msra.mxu1 %vm1748_vm1, %v1713_v50 }
 0x38f   : > { %2418 = vmatprep.subr.msk.mxu1 %vm1748_vm1, %v1728_v35 }
 0x392   : > { %2419 = vmatpush3.xpose.msk.msra.mxu1 %vm1748_vm1, %v1712_v55 }
 0x393   : > { %2420 = vmatprep.subr.msk.mxu1 %vm1748_vm1, %v1727_v9 }
 0x396   : > { %2421 = vmatpush3.xpose.msk.msra.mxu1 %vm1748_vm1, %v1711_v49 }
 0x397   : > { %2422 = vmatprep.subr.msk.mxu1 %vm1748_vm1, %v1726_v2 }
 0x39a   : > { %2423 = vmatpush3.xpose.msk.msra.mxu1 %vm1748_vm1, %v1710_v61 }
 0x39b   : > { %2424 = vmatprep.subr.msk.mxu1 %vm1748_vm1, %v1725_v16 }
 0x39e   : > { %2425 = vmatpush3.xpose.msk.msra.mxu1 %vm1748_vm1, %v1709_v17 }
 0x3a1   : > { %2427 = vmatmul.mubr.msk.f32.vlgmr.msra.gmra.mxu1 %vm1748_vm1, %v3343_v62 }
 0x461   : > { %v1914_v47 = vpop.f32.mrf.mxu1 }
 0x462   : > { %v1915_v11 = vadd.f32 %v1914_v47, %v1746_v38 }
 0x463   : > { %v1916_v12 = vpop.f32.mrf.mxu1 }
 0x464   : > { %v3446_v27 = vmax.f32 %v1915_v11, 0.0  ;;  %v1917_v28 = vadd.f32 %v1916_v12, %v1746_v38 }
 0x466   : > { %v1921_v37 = vand.u32 2147483647, %v3446_v27  ;;  %v1924_v33 = vand.u32 2139095040, %v3446_v27  ;;  %v3450_v42 = vmax.f32 %v1917_v28, 0.0  ;;  %vm1923_vm0 = vcmp.lt.s32.totalorder %v3446_v27, 0 }
 0x468   : > { %v1925_v43 = vshrl.u32 %v1924_v33, 23  ;;  %v1928_v41 = vand.u32 8388607, %v1921_v37  ;;  %v2027_v24 = vand.u32 2139095040, %v3450_v42  ;;  %v2024_v60 = vand.u32 2147483647, %v3450_v42 }
 0x469   : > { %vm3503_vm1 = vcmp.le.f32.partialorder %v1921_v37, 0.7853982 }
 0x46a   : > { %v2296_v62 = vadd.s32 4294967169, %v1925_v43  ;;  %v2028_v29 = vshrl.u32 %v2027_v24, 23  ;;  %v1929_v59 = vor.u32 8388608, %v1928_v41  ;;  %v2031_v58 = vand.u32 8388607, %v2024_v60 }
 0x46c   : > { %v1931_v30 = vadd.s32 1, %v2296_v62  ;;  %v2300_v31 = vadd.s32 4294967169, %v2028_v29  ;;  %v3458_v19 = vshll.u32 %v1929_v59, 8  ;;  %v2032_v34 = vor.u32 8388608, %v2031_v58 }
 0x46e   : > { %vm1932_vm2 = vcmp.gt.s32.totalorder %v1931_v30, 0  ;;  %v2034_v57 = vadd.s32 1, %v2300_v31  ;;  %v2072_v16 = vshll.u32 %v2032_v34, 8 }
 0x46f   : > { %v1933_v32 = vsel %vm1932_vm2, %v1931_v30, 0  ;;  %vm2026_vm2 = vcmp.lt.s32.totalorder %v3450_v42, 0 }
 0x470   : > { %v1934_v21 = vshrl.u32 %v1933_v32, 5  ;;  %v1935_v20 = vand.u32 31, %v1933_v32  ;;  %vm2035_vm3 = vcmp.gt.s32.totalorder %v2034_v57, 0 }
 0x471   : > { %v2036_v56 = vsel %vm2035_vm3, %v2034_v57, 0  ;;  %vm3515_vm3 = vcmp.le.f32.partialorder %v2024_v60, 0.7853982 }
 0x472   : > { %v1936_v18 = vsub.s32 32, %v1935_v20  ;;  %v1938_v22 = vshll.u32 %v2625_v39, %v1935_v20  ;;  %v1941_v44 = vshll.u32 %v2626_v40, %v1935_v20  ;;  %v1944_v14 = vshll.u32 %v2627_v26, %v1935_v20 }
 0x473   : > { %v1947_v53 = vshll.u32 %v2628_v45, %v1935_v20  ;;  %v1950_v25 = vshll.u32 %v2629_v0, %v1935_v20  ;;  %vm1953_vm4 = vcmp.lt.s32.totalorder %v1934_v21, 1  ;;  %vm1955_vm5 = vcmp.lt.s32.totalorder %v1934_v21, 3 }
 0x474   : > { %v1939_v51 = vshrl.u32 %v2626_v40, %v1936_v18  ;;  %v1942_v63 = vshrl.u32 %v2627_v26, %v1936_v18  ;;  %v1945_v54 = vshrl.u32 %v2628_v45, %v1936_v18  ;;  %v1937_v52 = vshrl.u32 %v2625_v39, %v1936_v18 }
 0x475   : > { %v1948_v1 = vshrl.u32 %v2629_v0, %v1936_v18  ;;  %v1951_v13 = vshrl.u32 %v2630_v3, %v1936_v18  ;;  %vm1956_vm6 = vcmp.lt.s32.totalorder %v1934_v21, 4  ;;  %v2038_v8 = vand.u32 31, %v2036_v56 }
 0x476   : > { %v1940_v23 = vor.u32 %v1939_v51, %v1938_v22  ;;  %v1943_v6 = vor.u32 %v1942_v63, %v1941_v44  ;;  %v1946_v7 = vor.u32 %v1945_v54, %v1944_v14  ;;  %vm1954_vm7 = vcmp.lt.s32.totalorder %v1934_v21, 2 }
 0x477   : > { %v1949_v50 = vor.u32 %v1948_v1, %v1947_v53  ;;  %v1952_v35 = vor.u32 %v1951_v13, %v1950_v25  ;;  %v2039_v15 = vsub.s32 32, %v2038_v8  ;;  %v2037_v11 = vshrl.u32 %v2036_v56, 5 }
 0x478   : > { %v1957_v55 = vsel %vm1953_vm4, %v1937_v52, %v1940_v23  ;;  %v1958_v48 = vsel %vm1956_vm6, %v1946_v7, 2102212464  ;;  %v1961_v10 = vsel %vm1953_vm4, %v1940_v23, %v1943_v6  ;;  %v1965_v9 = vsel %vm1953_vm4, %v1943_v6, %v1946_v7 }
 0x479   : > { %v1959_v36 = vsel %vm1955_vm5, %v1943_v6, %v1958_v48  ;;  %v1962_v49 = vsel %vm1956_vm6, %v1949_v50, 920167782  ;;  %v1966_v2 = vsel %vm1956_vm6, %v1952_v35, 1326507024  ;;  %v2041_v41 = vshll.u32 %v2625_v39, %v2038_v8 }
 0x47a   : > { %v1963_v61 = vsel %vm1955_vm5, %v1946_v7, %v1962_v49  ;;  %v1967_v46 = vsel %vm1955_vm5, %v1949_v50, %v1966_v2  ;;  %v1960_v17 = vsel %vm1954_vm7, %v1957_v55, %v1959_v36  ;;  %v2042_v24 = vshrl.u32 %v2626_v40, %v2039_v15 }
 0x47b   : > { %v1964_v38 = vsel %vm1954_vm7, %v1961_v10, %v1963_v61  ;;  %v1968_v47 = vsel %vm1954_vm7, %v1965_v9, %v1967_v46  ;;  %v2044_v62 = vshll.u32 %v2626_v40, %v2038_v8  ;;  %v2045_v29 = vshrl.u32 %v2627_v26, %v2039_v15 }
 0x47c   : > { %v3470_v12 = vmul.u32.u64.low %v3458_v19, %v1968_v47  ;;  %v3471_v28 = vmul.u32.u64.high %v3458_v19, %v1968_v47, %v3470_v12  ;;  %v3474_v33 = vmul.u32.u64.low %v3458_v19, %v1964_v38  ;;  %v3475_v43 = vmul.u32.u64.high %v3458_v19, %v1964_v38, %v3474_v33 }
 0x47d   : > { %v2047_v30 = vshll.u32 %v2627_v26, %v2038_v8  ;;  %v2048_v59 = vshrl.u32 %v2628_v45, %v2039_v15  ;;  %v2050_v31 = vshll.u32 %v2628_v45, %v2038_v8  ;;  %v2051_v58 = vshrl.u32 %v2629_v0, %v2039_v15 }
 0x47e   : > { %v2043_v32 = vor.u32 %v2042_v24, %v2041_v41  ;;  %v2046_v57 = vor.u32 %v2045_v29, %v2044_v62  ;;  %v2053_v21 = vshll.u32 %v2629_v0, %v2038_v8  ;;  %v2054_v20 = vshrl.u32 %v2630_v3, %v2039_v15 }
 0x47f   : > { %v1976_v18 = vmul.u32 %v3458_v19, %v1960_v17  ;;  %vm1978_vm8 = vc.u32 %v3471_v28, %v3474_v33  ;;  %v1979_v22 = vadd.s32 1, %v3475_v43  ;;  %v2049_v34 = vor.u32 %v2048_v59, %v2047_v30 }
 0x480   : > { %v2040_v44 = vshrl.u32 %v2625_v39, %v2039_v15  ;;  %v2052_v40 = vor.u32 %v2051_v58, %v2050_v31  ;;  %v2055_v14 = vor.u32 %v2054_v20, %v2053_v21  ;;  %vm2056_vm9 = vcmp.lt.s32.totalorder %v2037_v11, 1 }
 0x481   : > { %v1980_v26 = vsel %vm1978_vm8, %v1979_v22, %v3475_v43  ;;  %vm2058_vm10 = vcmp.lt.s32.totalorder %v2037_v11, 3  ;;  %vm2059_vm11 = vcmp.lt.s32.totalorder %v2037_v11, 4  ;;  %v2064_v45 = vsel %vm2056_vm9, %v2043_v32, %v2046_v57 }
 0x482   : > { %v1981_v53 = vadd.s32 %v1980_v26, %v1976_v18  ;;  %v2061_v0 = vsel %vm2059_vm11, %v2049_v34, 2102212464  ;;  %v2065_v25 = vsel %vm2059_vm11, %v2052_v40, 920167782  ;;  %v2068_v19 = vsel %vm2056_vm9, %v2046_v57, %v2049_v34 }
 0x483   : > { %vm2057_vm12 = vcmp.lt.s32.totalorder %v2037_v11, 2  ;;  %v2060_v51 = vsel %vm2056_vm9, %v2040_v44, %v2043_v32  ;;  %v2066_v63 = vsel %vm2058_vm10, %v2049_v34, %v2065_v25  ;;  %v2069_v54 = vsel %vm2059_vm11, %v2055_v14, 1326507024 }
 0x484   : > { %v1982_v52 = vadd.s32 536870912, %v1981_v53  ;;  %v2062_v1 = vsel %vm2058_vm10, %v2046_v57, %v2061_v0  ;;  %v2067_v3 = vsel %vm2057_vm12, %v2064_v45, %v2066_v63  ;;  %v2070_v39 = vsel %vm2058_vm10, %v2052_v40, %v2069_v54 }
 0x485   : > { %v2071_v13 = vsel %vm2057_vm12, %v2068_v19, %v2070_v39  ;;  %v3485_v23 = vmul.u32.u64.low %v2072_v16, %v2067_v3  ;;  %v3486_v6 = vmul.u32.u64.high %v2072_v16, %v2067_v3, %v3485_v23  ;;  %v2063_v35 = vsel %vm2057_vm12, %v2060_v51, %v2062_v1 }
 0x486   : > { %v1983_v7 = vshrl.u32 %v1982_v52, 30  ;;  %v3488_v56 = vmul.u32.u64.low %v2072_v16, %v2071_v13  ;;  %v3489_v50 = vmul.u32.u64.high %v2072_v16, %v2071_v13, %v3488_v56  ;;  %v2079_v10 = vmul.u32 %v2072_v16, %v2063_v35 }
 0x487   : > { %v2082_v55 = vadd.s32 1, %v3486_v6  ;;  %v1977_v16 = vadd.s32 %v3474_v33, %v3471_v28  ;;  %vm2013_vm7 = vweird.f32 %v3446_v27  ;;  %vm2116_vm11 = vweird.f32 %v3450_v42 }
 0x488   : > { %v1984_v8 = vshll.u32 %v1983_v7, 30  ;;  %vm2081_vm13 = vc.u32 %v3489_v50, %v3485_v23  ;;  %v2080_v34 = vadd.s32 %v3485_v23, %v3489_v50  ;;  %v2007_v51 = vsub.s32 4, %v1983_v7 }
 0x489   : > { %v2083_v9 = vsel %vm2081_vm13, %v2082_v55, %v3486_v6  ;;  %vm2167_vm12 = vcmp.lt.s32.totalorder %v582_v4, 256 }
 0x48a   : > { %v1985_v48 = vsub.s32 %v1981_v53, %v1984_v8  ;;  %v2084_v49 = vadd.s32 %v2083_v9, %v2079_v10  ;;  %v2008_v1 = vsel %vm1923_vm0, %v2007_v51, %v1983_v7 }
 0x48b   : > { %v2010_v37 = vsel %vm3503_vm1, 0, %v2008_v1 }
 0x48c   : > { %v1987_v36 = vsub.s32 0, %v1985_v48  ;;  %v2085_v15 = vadd.s32 536870912, %v2084_v49  ;;  %v2014_v56 = vand.u32 3, %v2010_v37 }
 0x48e   : > { %v2297_v2 = vmin.u32 %v1987_v36, %v1985_v48  ;;  %v3494_v46 = vshrl.u32 %v2085_v15, 30  ;;  %vm2019_vm4 = vcmp.eq.s32.totalorder %v2014_v56, 2  ;;  %vm2016_vm5 = vcmp.eq.s32.totalorder %v2014_v56, 0 }
 0x48f   : > { %vm2015_vm6 = vcmp.lt.s32.totalorder %v2014_v56, 2 }
 0x490   : > { %v1989_v61 = vclz %v2297_v2  ;;  %v2087_v38 = vshll.u32 %v3494_v46, 30  ;;  %v2110_v7 = vsub.s32 4, %v3494_v46 }
 0x492   : > { %v2298_v17 = vadd.s32 4294967294, %v1989_v61  ;;  %v2088_v11 = vsub.s32 %v2084_v49, %v2087_v38 }
 0x494   : > { %vm2299_vm14 = vcmp.lt.s32.totalorder %v2298_v17, 0  ;;  %v2090_v41 = vsub.s32 0, %v2088_v11 }
 0x495   : > { %v1992_v47 = vsel %vm2299_vm14, 0, %v2298_v17 }
 0x496   : > { %v1993_v12 = vsub.s32 32, %v1992_v47  ;;  %v1997_v43 = vsub.s32 4294967266, %v1992_v47  ;;  %v1994_v24 = vshll.u32 %v1985_v48, %v1992_v47  ;;  %v2301_v30 = vmin.u32 %v2090_v41, %v2088_v11 }
 0x497   : > { %v2111_v48 = vsel %vm2026_vm2, %v2110_v7, %v3494_v46 }
 0x498   : > { %v1995_v62 = vshrl.u32 %v1977_v16, %v1993_v12  ;;  %v1998_v29 = vadd.s32 127, %v1997_v43  ;;  %v2092_v58 = vclz %v2301_v30  ;;  %v2113_v49 = vsel %vm3515_vm3, 0, %v2111_v48 }
 0x499   : > { %v2117_v61 = vand.u32 3, %v2113_v49 }
 0x49a   : > { %v1996_v59 = vor.u32 %v1995_v62, %v1994_v24  ;;  %v1999_v31 = vshll.u32 %v1998_v29, 23  ;;  %v2302_v57 = vadd.s32 4294967294, %v2092_v58 }
 0x49b   : > { %vm2122_vm8 = vcmp.eq.s32.totalorder %v2117_v61, 2  ;;  %vm2119_vm9 = vcmp.eq.s32.totalorder %v2117_v61, 0  ;;  %vm2118_vm10 = vcmp.lt.s32.totalorder %v2117_v61, 2 }
 0x49c   : > { %v2000_v32 = vor.u32 4788187, %v1999_v31  ;;  %v2003_v20 = vcvt.s32.f32 %v1996_v59  ;;  %vm2303_vm15 = vcmp.lt.s32.totalorder %v2302_v57, 0 }
 0x49d   : > { %v2095_v22 = vsel %vm2303_vm15, 0, %v2302_v57  ;;  %v2631_v57 = vmov 1966171168  }
 0x49e   : > { %v2001_v21 = vand.u32 2147483647, %v2000_v32  ;;  %v2096_v28 = vsub.s32 32, %v2095_v22  ;;  %v2100_v33 = vsub.s32 4294967266, %v2095_v22  ;;  %v2097_v40 = vshll.u32 %v2088_v11, %v2095_v22 }
 0x4a0   : > { %v2004_v18 = vmul.f32 %v2003_v20, %v2001_v21  ;;  %v2098_v14 = vshrl.u32 %v2080_v34, %v2096_v28  ;;  %v2101_v26 = vadd.s32 127, %v2100_v33  ;;  %v2151_v21 = vunpack.c.l.s4 %v2631_v57 }
 0x4a2   : > { %v2005_v44 = vxor.u32 2147483648, %v2004_v18  ;;  %v2099_v25 = vor.u32 %v2098_v14, %v2097_v40  ;;  %v2102_v19 = vshll.u32 %v2101_v26, 23 }
 0x4a4   : > { %v2006_v53 = vsel %vm1923_vm0, %v2005_v44, %v2004_v18  ;;  %v2103_v63 = vor.u32 4788187, %v2102_v19  ;;  %v2106_v52 = vcvt.s32.f32 %v2099_v25 }
 0x4a5   : > { %v2009_v0 = vsel %vm3503_vm1, %v3446_v27, %v2006_v53 }
 0x4a6   : > { %2599 = vcosq.f32 %v2009_v0  ;;  %v2104_v54 = vand.u32 2147483647, %v2103_v63 }
 0x4a7   : > { %2601 = vsinq.f32 %v2009_v0 }
 0x4a8   : > { %v2107_v3 = vmul.f32 %v2106_v52, %v2104_v54 }
 0x4aa   : > { %v2108_v39 = vxor.u32 2147483648, %v2107_v3 }
 0x4ac   : > { %v2109_v23 = vsel %vm2026_vm2, %v2108_v39, %v2107_v3 }
 0x4ad   : > { %v2112_v6 = vsel %vm3515_vm3, %v3450_v42, %v2109_v23  ;;  %v2152_v42 = vunpack.c.0.s8 %v2151_v21 }
 0x4ae   : > { %2603 = vcosq.f32 %v2112_v6 }
 0x4af   : > { %2605 = vsinq.f32 %v2112_v6  ;;  %v2155_v18 = vsub.s32 %v2152_v42, %v2871_v5 }
 0x4b3   : > { %v2600_v50 = vpop.eup %2599 }
 0x4b4   : > { %v2602_v35 = vpop.eup %2601  ;;  %v2020_v8 = vxor.u32 2147483648, %v2600_v50 }
 0x4b5   : > { %v2017_v55 = vxor.u32 2147483648, %v2602_v35 }
 0x4b6   : > { %v2021_v60 = vsel %vm2019_vm4, %v2020_v8, %v2602_v35 }
 0x4b7   : > { %v2018_v10 = vsel %vm2016_vm5, %v2600_v50, %v2017_v55 }
 0x4b8   : > { %v2022_v9 = vsel %vm2015_vm6, %v2018_v10, %v2021_v60 }
 0x4b9   : > { %v2023_v36 = vsel %vm2013_vm7, nan, %v2022_v9 }
 0x4ba   : > { %v2129_v2 = vrot.slane %v2023_v36, 1 }
 0x4bb   : > { %v2604_v17 = vpop.eup %2603 }
 0x4bc   : > { %v2133_v15 = vmul.f32 %v2129_v2, %v2023_v36  ;;  %v2606_v38 = vpop.eup %2605  ;;  %v2123_v47 = vxor.u32 2147483648, %v2604_v17 }
 0x4bd   : > { %v2120_v16 = vxor.u32 2147483648, %v2606_v38 }
 0x4be   : > { %v2135_v11 = vsub.f32 0.0, %v2133_v15  ;;  %v2124_v46 = vsel %vm2122_vm8, %v2123_v47, %v2606_v38 }
 0x4bf   : > { %v2121_v12 = vsel %vm2119_vm9, %v2604_v17, %v2120_v16 }
 0x4c0   : > { %v2125_v27 = vsel %vm2118_vm10, %v2121_v12, %v2124_v46  ;;  %v2137_v43 = vmul.f32 1.442695, %v2135_v11 }
 0x4c1   : > { %v2126_v41 = vsel %vm2116_vm11, nan, %v2125_v27 }
 0x4c2   : > { %v2130_v24 = vrot.slane %v2126_v41, 1  ;;  %2607 = vpow2.f32 %v2137_v43 }
 0x4c4   : > { %v2134_v62 = vmul.f32 %v2130_v24, %v2126_v41 }
 0x4c6   : > { %v2136_v29 = vsub.f32 0.0, %v2134_v62 }
 0x4c8   : > { %v2139_v30 = vmul.f32 1.442695, %v2136_v29 }
 0x4ca   : > { %2609 = vpow2.f32 %v2139_v30 }
 0x4cf   : > { %v2608_v59 = vpop.eup %2607 }
 0x4d0   : > { %v2141_v31 = vadd.f32 1.0, %v2608_v59 }
 0x4d2   : > { %2611 = vrcp.f32 %v2141_v31 }
 0x4d7   : > { %v2610_v58 = vpop.eup %2609 }
 0x4d8   : > { %v2142_v32 = vadd.f32 1.0, %v2610_v58 }
 0x4da   : > { %2613 = vrcp.f32 %v2142_v32 }
 0x4df   : > { %v2612_v20 = vpop.eup %2611 }
 0x4e7   : > { %v2614_v22 = vpop.eup %2613 }
 0x4e8   : > { %v2149_v34 = vcombine.low %v2612_v20, %v2614_v22 }
 0x4ea   : > { %v2156_v28 = vrot.slane %v2149_v34, %v2155_v18 }
 0x4ec   : > { %v2163_v33 = vrot.slane %v2156_v28, %v2155_v18 }
 0x4ee   : > { %2169 = vst.msk [vmem:[%s386_s19] sm:$0x3] %vm2167_vm12, %v2163_v33 }
 0x4ef PF: > { %s21_s17 = sadd.s32 1, %s2621_s17  }
 0x4f0   : > { %p18_p5 = scmp.ge.s32.totalorder %s21_s17, 4  }
 0x4f2   :  { %20 = sbr.rel (!%p18_p5) target bundleno = 1 (0x1), region = 94 }

</bundles_post_ra>
